<compile_context>
chip_gen: v6e
topology: v6e:2x2x1
jax: 0.10.0
libtpu: 0.0.40
codegen_flags: <defaults>
</compile_context>

<pallas_src>
import functools
import math

import jax
import jax.numpy as jnp
from jax.experimental import pallas as pl
from jax.experimental.pallas import tpu as pltpu


# ----------------------------------------------------------------------------
# Pallas kernel (factory: arg count depends on num_layers / num_directions)
# ----------------------------------------------------------------------------
def make_fused_gru_kernel(seq_len, batch, hidden, num_layers, num_dir):
    S, B, H, L, D = seq_len, batch, hidden, num_layers, num_dir

    def kernel(*refs):
        it = iter(refs)
        x_ref = next(it)                                     # (S*B, I0)
        h0_ref = next(it)                                    # (L*D, B, H)
        layers = [(next(it), next(it), next(it), next(it)) for _ in range(L)]
        fcw_ref = next(it)                                   # (D*H, C)
        fcb_ref = next(it)                                   # (1, C)
        out_ref = next(it)                                   # (B, C)
        gi_refs = [next(it) for _ in range(D)]               # D x (S*B, 3H)
        act_scr = next(it)                                   # (S*B, D*H)

        for l in range(L):
            wih_ref, whh_ref, bi_ref, bhn_ref = layers[l]

            # ---- prologue: one fused matmul over (time*batch, directions*gates) ----
            x_in = x_ref[...] if l == 0 else act_scr[...]
            gi_all = jnp.dot(x_in, wih_ref[...],
                             preferred_element_type=jnp.float32) + bi_ref[...]
            for d in range(D):
                gi_refs[d][...] = gi_all[:, d * 3 * H:(d + 1) * 3 * H]

            # hoisted per-direction constants (outside the unrolled serial loop)
            whh = [whh_ref[d] for d in range(D)]                       # (H, 3H)
            bhn = [jnp.broadcast_to(bhn_ref[d], (B, H)) for d in range(D)]
            h = [h0_ref[l * D + d] for d in range(D)]                  # (B, H)

            # ---- serial recurrence: directions interleaved, static time indices ----
            for k in range(S):
                for d in range(D):
                    t = k if d == 0 else S - 1 - k
                    gi = gi_refs[d][t * B:(t + 1) * B, :]              # (B, 3H)
                    gh = jnp.dot(h[d], whh[d],
                                 preferred_element_type=jnp.float32)   # (B, 3H)
                    # r and z share one sigmoid over a (B, 2H) slab (one EUP stream)
                    rz = jax.nn.sigmoid(gi[:, :2 * H] + gh[:, :2 * H])
                    r = rz[:, :H]
                    z = rz[:, H:]
                    n = jnp.tanh(gi[:, 2 * H:] + r * (gh[:, 2 * H:] + bhn[d]))
                    h[d] = n + z * (h[d] - n)
                    act_scr[t * B:(t + 1) * B, d * H:(d + 1) * H] = h[d]

        # ---- final FC on out[-1] (last timestep of top layer, all directions) ----
        last = act_scr[(S - 1) * B:S * B, :]                           # (B, D*H)
        out_ref[...] = jnp.dot(last, fcw_ref[...],
                               preferred_element_type=jnp.float32) + fcb_ref[...]

    return kernel


# ----------------------------------------------------------------------------
# Wrapper
# ----------------------------------------------------------------------------
@functools.partial(jax.jit,
                   static_argnames=("seq_len", "hidden_size", "num_layers",
                                    "bidirectional"))
def gru_forward(params, inputs, h0, *, seq_len, hidden_size, num_layers,
                bidirectional):
    """Replicates GRU.forward: .view(seq_len, batch, -1) -> nn.GRU -> fc(out[-1])."""
    batch = inputs.shape[0]
    H = hidden_size
    D = 2 if bidirectional else 1
    # torch `.view(seq_len, batch, -1)` reinterprets memory row-major; flattening the
    # (seq, batch) axes keeps exactly that ordering as an (S*B, feat) matrix (free view).
    x = jnp.reshape(inputs, (seq_len * batch, -1)).astype(jnp.float32)

    args = [x, h0]
    for p in params["layers"]:
        args += [p["w_ih_cat"], p["w_hh"], p["b_i_cat"], p["b_hn"]]
    args += [params["fc_w_t"], params["fc_b"]]

    num_classes = params["fc_w_t"].shape[-1]
    kernel = make_fused_gru_kernel(seq_len, batch, H, num_layers, D)

    scratch_shapes = [pltpu.VMEM((seq_len * batch, 3 * H), jnp.float32)
                      for _ in range(D)]
    scratch_shapes.append(pltpu.VMEM((seq_len * batch, D * H), jnp.float32))

    return pl.pallas_call(
        kernel,
        out_shape=jax.ShapeDtypeStruct((batch, num_classes), jnp.float32),
        scratch_shapes=scratch_shapes,
    )(*args)


# ----------------------------------------------------------------------------
# Parameter init (PyTorch-style uniform(-1/sqrt(H), 1/sqrt(H)), stored pre-fused)
# ----------------------------------------------------------------------------
def init_params(key, input_size, hidden_size, num_layers, num_classes,
                bidirectional):
    H = hidden_size
    D = 2 if bidirectional else 1
    k = 1.0 / math.sqrt(H)
    params = {"layers": []}
    for layer in range(num_layers):
        in_sz = input_size if layer == 0 else H * D
        wih_l, whh_l, bi_l, bhn_l = [], [], [], []
        for _ in range(D):
            key, k1, k2, k3, k4 = jax.random.split(key, 5)
            w_ih = jax.random.uniform(k1, (3 * H, in_sz), jnp.float32, -k, k)
            w_hh = jax.random.uniform(k2, (3 * H, H), jnp.float32, -k, k)
            b_ih = jax.random.uniform(k3, (3 * H,), jnp.float32, -k, k)
            b_hh = jax.random.uniform(k4, (3 * H,), jnp.float32, -k, k)
            wih_l.append(w_ih.T)                    # (in, 3H), gate order r|z|n
            whh_l.append(w_hh.T)                    # (H, 3H)
            # fold r/z hidden biases into the input-side bias (applied in prologue);
            # the n-gate hidden bias must stay inside r * (h @ Whh_n + b_hn).
            bi_l.append(jnp.concatenate([b_ih[:2 * H] + b_hh[:2 * H], b_ih[2 * H:]]))
            bhn_l.append(b_hh[2 * H:].reshape(1, H))
        params["layers"].append(dict(
            w_ih_cat=jnp.concatenate(wih_l, axis=1),                    # (in, D*3H)
            w_hh=jnp.stack(whh_l),                                      # (D, H, 3H)
            b_i_cat=jnp.concatenate(bi_l).reshape(1, D * 3 * H),        # (1, D*3H)
            b_hn=jnp.stack(bhn_l),                                      # (D, 1, H)
        ))
    fc_in = H * D
    kf = 1.0 / math.sqrt(fc_in)
    key, k1, k2 = jax.random.split(key, 3)
    params["fc_w_t"] = jax.random.uniform(k1, (fc_in, num_classes), jnp.float32,
                                          -kf, kf)
    params["fc_b"] = jax.random.uniform(k2, (1, num_classes), jnp.float32, -kf, kf)
    return params


# ----------------------------------------------------------------------------
# Pure-JAX reference (sanity check)
# ----------------------------------------------------------------------------
def gru_forward_ref(params, inputs, h0, seq_len, hidden_size, num_layers,
                    bidirectional):
    batch = inputs.shape[0]
    H = hidden_size
    D = 2 if bidirectional else 1
    x = jnp.reshape(inputs, (seq_len, batch, -1)).astype(jnp.float32)

    def run_dir(xs, wih, whh, b_i, b_hn, h):
        outs = []
        for t in range(xs.shape[0]):
            gi = xs[t] @ wih + b_i
            gh = h @ whh
            r = jax.nn.sigmoid(gi[:, :H] + gh[:, :H])
            z = jax.nn.sigmoid(gi[:, H:2 * H] + gh[:, H:2 * H])
            n = jnp.tanh(gi[:, 2 * H:] + r * (gh[:, 2 * H:] + b_hn))
            h = (1.0 - z) * n + z * h
            outs.append(h)
        return jnp.stack(outs, axis=0)

    for layer in range(num_layers):
        p = params["layers"][layer]
        outs = []
        for d in range(D):
            wih = p["w_ih_cat"][:, d * 3 * H:(d + 1) * 3 * H]
            b_i = p["b_i_cat"][:, d * 3 * H:(d + 1) * 3 * H]
            whh = p["w_hh"][d]
            b_hn = p["b_hn"][d]
            xs = x if d == 0 else jnp.flip(x, 0)
            o = run_dir(xs, wih, whh, b_i, b_hn, h0[layer * D + d])
            if d == 1:
                o = jnp.flip(o, 0)
            outs.append(o)
        x = jnp.concatenate(outs, axis=-1) if D == 2 else outs[0]
    return x[-1] @ params["fc_w_t"] + params["fc_b"]


# ----------------------------------------------------------------------------
if __name__ == "__main__":
    batch = 4
    seq_len = 8          # VIDEO_CUT_LENGTH
    input_size = 64
    hidden_size = 32
    num_layers = 2
    num_classes = 10

    key = jax.random.PRNGKey(0)
    k_in, k_h0u, k_h0b, k_pu, k_pb = jax.random.split(key, 5)

    # inputs: (batch, seq, feat) -> viewed as (seq, batch, feat) like torch .view
    inputs = jax.random.normal(k_in, (batch, seq_len, input_size), jnp.float32)

    # --- unidirectional path ---
    h0_u = jax.random.normal(k_h0u, (num_layers, batch, hidden_size), jnp.float32)
    params_u = init_params(k_pu, input_size, hidden_size, num_layers,
                           num_classes, bidirectional=False)
    logits_u = jax.block_until_ready(
        gru_forward(params_u, inputs, h0_u, seq_len=seq_len,
                    hidden_size=hidden_size, num_layers=num_layers,
                    bidirectional=False))
    ref_u = gru_forward_ref(params_u, inputs, h0_u, seq_len, hidden_size,
                            num_layers, bidirectional=False)
    assert logits_u.shape == (batch, num_classes)
    assert jnp.max(jnp.abs(logits_u - ref_u)) < 1e-3, "unidirectional mismatch"

    # --- bidirectional path ---
    h0_b = jax.random.normal(k_h0b, (num_layers * 2, batch, hidden_size),
                             jnp.float32)
    params_b = init_params(k_pb, input_size, hidden_size, num_layers,
                           num_classes, bidirectional=True)
    logits_b = jax.block_until_ready(
        gru_forward(params_b, inputs, h0_b, seq_len=seq_len,
                    hidden_size=hidden_size, num_layers=num_layers,
                    bidirectional=True))
    ref_b = gru_forward_ref(params_b, inputs, h0_b, seq_len, hidden_size,
                            num_layers, bidirectional=True)
    assert logits_b.shape == (batch, num_classes)
    assert jnp.max(jnp.abs(logits_b - ref_b)) < 1e-3, "bidirectional mismatch"

    print("KERNEL_OK")
</pallas_src>

<mosaic_0001>
module attributes {stable_mosaic.version = 11 : i64} {
  func.func @kernel(%arg0: memref<32x64xf32, #tpu.memory_space<vmem>>, %arg1: memref<2x4x32xf32, #tpu.memory_space<vmem>>, %arg2: memref<64x96xf32, #tpu.memory_space<vmem>>, %arg3: memref<1x32x96xf32, #tpu.memory_space<vmem>>, %arg4: memref<1x96xf32, #tpu.memory_space<vmem>>, %arg5: memref<1x1x32xf32, #tpu.memory_space<vmem>>, %arg6: memref<32x96xf32, #tpu.memory_space<vmem>>, %arg7: memref<1x32x96xf32, #tpu.memory_space<vmem>>, %arg8: memref<1x96xf32, #tpu.memory_space<vmem>>, %arg9: memref<1x1x32xf32, #tpu.memory_space<vmem>>, %arg10: memref<32x10xf32, #tpu.memory_space<vmem>>, %arg11: memref<1x10xf32, #tpu.memory_space<vmem>>, %arg12: memref<4x10xf32, #tpu.memory_space<vmem>>, %arg13: memref<32x96xf32, #tpu.memory_space<vmem>>, %arg14: memref<32x32xf32, #tpu.memory_space<vmem>>) attributes {dimension_semantics = [], scalar_prefetch = 0 : i64, scratch_operands = 2 : i64, tpu.core_type = #tpu.core_type<tc>} {
    %c0 = arith.constant 0 : index
    %c0_0 = arith.constant 0 : index
    %0 = vector.load %arg0[%c0, %c0_0] : memref<32x64xf32, #tpu.memory_space<vmem>>, vector<32x64xf32>
    %c0_1 = arith.constant 0 : index
    %c0_2 = arith.constant 0 : index
    %1 = vector.load %arg2[%c0_1, %c0_2] : memref<64x96xf32, #tpu.memory_space<vmem>>, vector<64x96xf32>
    %cst = arith.constant dense<0.000000e+00> : vector<32x96xf32>
    %2 = tpu.matmul %0, %1, %cst {dimension_numbers = #tpu.dot_dimension_numbers<[1], [0], [0], [1], [0, 0, 1, 1], [], []>} : vector<32x64xf32>, vector<64x96xf32>, vector<32x96xf32> -> vector<32x96xf32>
    %c0_3 = arith.constant 0 : index
    %c0_4 = arith.constant 0 : index
    %3 = vector.load %arg4[%c0_3, %c0_4] : memref<1x96xf32, #tpu.memory_space<vmem>>, vector<1x96xf32>
    %4 = vector.broadcast %3 : vector<1x96xf32> to vector<32x96xf32>
    %5 = arith.addf %2, %4 : vector<32x96xf32>
    %c0_5 = arith.constant 0 : index
    %c0_6 = arith.constant 0 : index
    %6 = vector.load %arg13[%c0_5, %c0_6] : memref<32x96xf32, #tpu.memory_space<vmem>>, vector<32x96xf32>
    tpu.vector_store %arg13[%c0_5, %c0_6], %5 {strides = array<i32>} : memref<32x96xf32, #tpu.memory_space<vmem>>, vector<32x96xf32>,
    %c0_7 = arith.constant 0 : index
    %c0_8 = arith.constant 0 : index
    %c0_9 = arith.constant 0 : index
    %7 = vector.load %arg3[%c0_7, %c0_8, %c0_9] : memref<1x32x96xf32, #tpu.memory_space<vmem>>, vector<1x32x96xf32>
    %8 = vector.shape_cast %7 : vector<1x32x96xf32> to vector<32x96xf32>
    %c0_10 = arith.constant 0 : index
    %c0_11 = arith.constant 0 : index
    %c0_12 = arith.constant 0 : index
    %9 = vector.load %arg5[%c0_10, %c0_11, %c0_12] : memref<1x1x32xf32, #tpu.memory_space<vmem>>, vector<1x1x32xf32>
    %10 = vector.shape_cast %9 : vector<1x1x32xf32> to vector<1x32xf32>
    %11 = vector.shape_cast %10 : vector<1x32xf32> to vector<1x32xf32>
    %12 = vector.broadcast %11 : vector<1x32xf32> to vector<4x32xf32>
    %c0_13 = arith.constant 0 : index
    %c0_14 = arith.constant 0 : index
    %c0_15 = arith.constant 0 : index
    %13 = vector.load %arg1[%c0_13, %c0_14, %c0_15] : memref<2x4x32xf32, #tpu.memory_space<vmem>>, vector<1x4x32xf32>
    %14 = vector.shape_cast %13 : vector<1x4x32xf32> to vector<4x32xf32>
    %c0_16 = arith.constant 0 : index
    %c0_17 = arith.constant 0 : index
    %15 = vector.load %arg13[%c0_16, %c0_17] : memref<32x96xf32, #tpu.memory_space<vmem>>, vector<4x96xf32>
    %cst_18 = arith.constant dense<0.000000e+00> : vector<4x96xf32>
    %16 = tpu.matmul %14, %8, %cst_18 {dimension_numbers = #tpu.dot_dimension_numbers<[1], [0], [0], [1], [0, 0, 1, 1], [], []>} : vector<4x32xf32>, vector<32x96xf32>, vector<4x96xf32> -> vector<4x96xf32>
    %17 = vector.extract_strided_slice %15 {offsets = [0, 0], sizes = [4, 64], strides = [1, 1]} : vector<4x96xf32> to vector<4x64xf32>
    %18 = vector.extract_strided_slice %16 {offsets = [0, 0], sizes = [4, 64], strides = [1, 1]} : vector<4x96xf32> to vector<4x64xf32>
    %19 = arith.addf %17, %18 : vector<4x64xf32>
    %20 = arith.negf %19 : vector<4x64xf32>
    %21 = math.exp %20 : vector<4x64xf32>
    %cst_19 = arith.constant 1.000000e+00 : f32
    %22 = vector.broadcast %cst_19 : f32 to vector<4x64xf32>
    %23 = arith.addf %22, %21 : vector<4x64xf32>
    %24 = arith.divf %22, %23 : vector<4x64xf32>
    %25 = vector.extract_strided_slice %24 {offsets = [0, 0], sizes = [4, 32], strides = [1, 1]} : vector<4x64xf32> to vector<4x32xf32>
    %26 = vector.extract_strided_slice %24 {offsets = [0, 32], sizes = [4, 32], strides = [1, 1]} : vector<4x64xf32> to vector<4x32xf32>
    %27 = vector.extract_strided_slice %15 {offsets = [0, 64], sizes = [4, 32], strides = [1, 1]} : vector<4x96xf32> to vector<4x32xf32>
    %28 = vector.extract_strided_slice %16 {offsets = [0, 64], sizes = [4, 32], strides = [1, 1]} : vector<4x96xf32> to vector<4x32xf32>
    %29 = arith.addf %28, %12 : vector<4x32xf32>
    %30 = arith.mulf %25, %29 : vector<4x32xf32>
    %31 = arith.addf %27, %30 : vector<4x32xf32>
    %32 = math.tanh %31 : vector<4x32xf32>
    %33 = arith.subf %14, %32 : vector<4x32xf32>
    %34 = arith.mulf %26, %33 : vector<4x32xf32>
    %35 = arith.addf %32, %34 : vector<4x32xf32>
    %c0_20 = arith.constant 0 : index
    %c0_21 = arith.constant 0 : index
    %36 = vector.load %arg14[%c0_20, %c0_21] : memref<32x32xf32, #tpu.memory_space<vmem>>, vector<4x32xf32>
    tpu.vector_store %arg14[%c0_20, %c0_21], %35 {strides = array<i32>} : memref<32x32xf32, #tpu.memory_space<vmem>>, vector<4x32xf32>,
    %c4 = arith.constant 4 : index
    %c0_22 = arith.constant 0 : index
    %37 = vector.load %arg13[%c4, %c0_22] : memref<32x96xf32, #tpu.memory_space<vmem>>, vector<4x96xf32>
    %cst_23 = arith.constant dense<0.000000e+00> : vector<4x96xf32>
    %38 = tpu.matmul %35, %8, %cst_23 {dimension_numbers = #tpu.dot_dimension_numbers<[1], [0], [0], [1], [0, 0, 1, 1], [], []>} : vector<4x32xf32>, vector<32x96xf32>, vector<4x96xf32> -> vector<4x96xf32>
    %39 = vector.extract_strided_slice %37 {offsets = [0, 0], sizes = [4, 64], strides = [1, 1]} : vector<4x96xf32> to vector<4x64xf32>
    %40 = vector.extract_strided_slice %38 {offsets = [0, 0], sizes = [4, 64], strides = [1, 1]} : vector<4x96xf32> to vector<4x64xf32>
    %41 = arith.addf %39, %40 : vector<4x64xf32>
    %42 = arith.negf %41 : vector<4x64xf32>
    %43 = math.exp %42 : vector<4x64xf32>
    %cst_24 = arith.constant 1.000000e+00 : f32
    %44 = vector.broadcast %cst_24 : f32 to vector<4x64xf32>
    %45 = arith.addf %44, %43 : vector<4x64xf32>
    %46 = arith.divf %44, %45 : vector<4x64xf32>
    %47 = vector.extract_strided_slice %46 {offsets = [0, 0], sizes = [4, 32], strides = [1, 1]} : vector<4x64xf32> to vector<4x32xf32>
    %48 = vector.extract_strided_slice %46 {offsets = [0, 32], sizes = [4, 32], strides = [1, 1]} : vector<4x64xf32> to vector<4x32xf32>
    %49 = vector.extract_strided_slice %37 {offsets = [0, 64], sizes = [4, 32], strides = [1, 1]} : vector<4x96xf32> to vector<4x32xf32>
    %50 = vector.extract_strided_slice %38 {offsets = [0, 64], sizes = [4, 32], strides = [1, 1]} : vector<4x96xf32> to vector<4x32xf32>
    %51 = arith.addf %50, %12 : vector<4x32xf32>
    %52 = arith.mulf %47, %51 : vector<4x32xf32>
    %53 = arith.addf %49, %52 : vector<4x32xf32>
    %54 = math.tanh %53 : vector<4x32xf32>
    %55 = arith.subf %35, %54 : vector<4x32xf32>
    %56 = arith.mulf %48, %55 : vector<4x32xf32>
    %57 = arith.addf %54, %56 : vector<4x32xf32>
    %c4_25 = arith.constant 4 : index
    %c0_26 = arith.constant 0 : index
    %58 = vector.load %arg14[%c4_25, %c0_26] : memref<32x32xf32, #tpu.memory_space<vmem>>, vector<4x32xf32>
    tpu.vector_store %arg14[%c4_25, %c0_26], %57 {strides = array<i32>} : memref<32x32xf32, #tpu.memory_space<vmem>>, vector<4x32xf32>,
    %c8 = arith.constant 8 : index
    %c0_27 = arith.constant 0 : index
    %59 = vector.load %arg13[%c8, %c0_27] : memref<32x96xf32, #tpu.memory_space<vmem>>, vector<4x96xf32>
    %cst_28 = arith.constant dense<0.000000e+00> : vector<4x96xf32>
    %60 = tpu.matmul %57, %8, %cst_28 {dimension_numbers = #tpu.dot_dimension_numbers<[1], [0], [0], [1], [0, 0, 1, 1], [], []>} : vector<4x32xf32>, vector<32x96xf32>, vector<4x96xf32> -> vector<4x96xf32>
    %61 = vector.extract_strided_slice %59 {offsets = [0, 0], sizes = [4, 64], strides = [1, 1]} : vector<4x96xf32> to vector<4x64xf32>
    %62 = vector.extract_strided_slice %60 {offsets = [0, 0], sizes = [4, 64], strides = [1, 1]} : vector<4x96xf32> to vector<4x64xf32>
    %63 = arith.addf %61, %62 : vector<4x64xf32>
    %64 = arith.negf %63 : vector<4x64xf32>
    %65 = math.exp %64 : vector<4x64xf32>
    %cst_29 = arith.constant 1.000000e+00 : f32
    %66 = vector.broadcast %cst_29 : f32 to vector<4x64xf32>
    %67 = arith.addf %66, %65 : vector<4x64xf32>
    %68 = arith.divf %66, %67 : vector<4x64xf32>
    %69 = vector.extract_strided_slice %68 {offsets = [0, 0], sizes = [4, 32], strides = [1, 1]} : vector<4x64xf32> to vector<4x32xf32>
    %70 = vector.extract_strided_slice %68 {offsets = [0, 32], sizes = [4, 32], strides = [1, 1]} : vector<4x64xf32> to vector<4x32xf32>
    %71 = vector.extract_strided_slice %59 {offsets = [0, 64], sizes = [4, 32], strides = [1, 1]} : vector<4x96xf32> to vector<4x32xf32>
    %72 = vector.extract_strided_slice %60 {offsets = [0, 64], sizes = [4, 32], strides = [1, 1]} : vector<4x96xf32> to vector<4x32xf32>
    %73 = arith.addf %72, %12 : vector<4x32xf32>
    %74 = arith.mulf %69, %73 : vector<4x32xf32>
    %75 = arith.addf %71, %74 : vector<4x32xf32>
    %76 = math.tanh %75 : vector<4x32xf32>
    %77 = arith.subf %57, %76 : vector<4x32xf32>
    %78 = arith.mulf %70, %77 : vector<4x32xf32>
    %79 = arith.addf %76, %78 : vector<4x32xf32>
    %c8_30 = arith.constant 8 : index
    %c0_31 = arith.constant 0 : index
    %80 = vector.load %arg14[%c8_30, %c0_31] : memref<32x32xf32, #tpu.memory_space<vmem>>, vector<4x32xf32>
    tpu.vector_store %arg14[%c8_30, %c0_31], %79 {strides = array<i32>} : memref<32x32xf32, #tpu.memory_space<vmem>>, vector<4x32xf32>,
    %c12 = arith.constant 12 : index
    %c0_32 = arith.constant 0 : index
    %81 = vector.load %arg13[%c12, %c0_32] : memref<32x96xf32, #tpu.memory_space<vmem>>, vector<4x96xf32>
    %cst_33 = arith.constant dense<0.000000e+00> : vector<4x96xf32>
    %82 = tpu.matmul %79, %8, %cst_33 {dimension_numbers = #tpu.dot_dimension_numbers<[1], [0], [0], [1], [0, 0, 1, 1], [], []>} : vector<4x32xf32>, vector<32x96xf32>, vector<4x96xf32> -> vector<4x96xf32>
    %83 = vector.extract_strided_slice %81 {offsets = [0, 0], sizes = [4, 64], strides = [1, 1]} : vector<4x96xf32> to vector<4x64xf32>
    %84 = vector.extract_strided_slice %82 {offsets = [0, 0], sizes = [4, 64], strides = [1, 1]} : vector<4x96xf32> to vector<4x64xf32>
    %85 = arith.addf %83, %84 : vector<4x64xf32>
    %86 = arith.negf %85 : vector<4x64xf32>
    %87 = math.exp %86 : vector<4x64xf32>
    %cst_34 = arith.constant 1.000000e+00 : f32
    %88 = vector.broadcast %cst_34 : f32 to vector<4x64xf32>
    %89 = arith.addf %88, %87 : vector<4x64xf32>
    %90 = arith.divf %88, %89 : vector<4x64xf32>
    %91 = vector.extract_strided_slice %90 {offsets = [0, 0], sizes = [4, 32], strides = [1, 1]} : vector<4x64xf32> to vector<4x32xf32>
    %92 = vector.extract_strided_slice %90 {offsets = [0, 32], sizes = [4, 32], strides = [1, 1]} : vector<4x64xf32> to vector<4x32xf32>
    %93 = vector.extract_strided_slice %81 {offsets = [0, 64], sizes = [4, 32], strides = [1, 1]} : vector<4x96xf32> to vector<4x32xf32>
    %94 = vector.extract_strided_slice %82 {offsets = [0, 64], sizes = [4, 32], strides = [1, 1]} : vector<4x96xf32> to vector<4x32xf32>
    %95 = arith.addf %94, %12 : vector<4x32xf32>
    %96 = arith.mulf %91, %95 : vector<4x32xf32>
    %97 = arith.addf %93, %96 : vector<4x32xf32>
    %98 = math.tanh %97 : vector<4x32xf32>
    %99 = arith.subf %79, %98 : vector<4x32xf32>
    %100 = arith.mulf %92, %99 : vector<4x32xf32>
    %101 = arith.addf %98, %100 : vector<4x32xf32>
    %c12_35 = arith.constant 12 : index
    %c0_36 = arith.constant 0 : index
    %102 = vector.load %arg14[%c12_35, %c0_36] : memref<32x32xf32, #tpu.memory_space<vmem>>, vector<4x32xf32>
    tpu.vector_store %arg14[%c12_35, %c0_36], %101 {strides = array<i32>} : memref<32x32xf32, #tpu.memory_space<vmem>>, vector<4x32xf32>,
    %c16 = arith.constant 16 : index
    %c0_37 = arith.constant 0 : index
    %103 = vector.load %arg13[%c16, %c0_37] : memref<32x96xf32, #tpu.memory_space<vmem>>, vector<4x96xf32>
    %cst_38 = arith.constant dense<0.000000e+00> : vector<4x96xf32>
    %104 = tpu.matmul %101, %8, %cst_38 {dimension_numbers = #tpu.dot_dimension_numbers<[1], [0], [0], [1], [0, 0, 1, 1], [], []>} : vector<4x32xf32>, vector<32x96xf32>, vector<4x96xf32> -> vector<4x96xf32>
    %105 = vector.extract_strided_slice %103 {offsets = [0, 0], sizes = [4, 64], strides = [1, 1]} : vector<4x96xf32> to vector<4x64xf32>
    %106 = vector.extract_strided_slice %104 {offsets = [0, 0], sizes = [4, 64], strides = [1, 1]} : vector<4x96xf32> to vector<4x64xf32>
    %107 = arith.addf %105, %106 : vector<4x64xf32>
    %108 = arith.negf %107 : vector<4x64xf32>
    %109 = math.exp %108 : vector<4x64xf32>
    %cst_39 = arith.constant 1.000000e+00 : f32
    %110 = vector.broadcast %cst_39 : f32 to vector<4x64xf32>
    %111 = arith.addf %110, %109 : vector<4x64xf32>
    %112 = arith.divf %110, %111 : vector<4x64xf32>
    %113 = vector.extract_strided_slice %112 {offsets = [0, 0], sizes = [4, 32], strides = [1, 1]} : vector<4x64xf32> to vector<4x32xf32>
    %114 = vector.extract_strided_slice %112 {offsets = [0, 32], sizes = [4, 32], strides = [1, 1]} : vector<4x64xf32> to vector<4x32xf32>
    %115 = vector.extract_strided_slice %103 {offsets = [0, 64], sizes = [4, 32], strides = [1, 1]} : vector<4x96xf32> to vector<4x32xf32>
    %116 = vector.extract_strided_slice %104 {offsets = [0, 64], sizes = [4, 32], strides = [1, 1]} : vector<4x96xf32> to vector<4x32xf32>
    %117 = arith.addf %116, %12 : vector<4x32xf32>
    %118 = arith.mulf %113, %117 : vector<4x32xf32>
    %119 = arith.addf %115, %118 : vector<4x32xf32>
    %120 = math.tanh %119 : vector<4x32xf32>
    %121 = arith.subf %101, %120 : vector<4x32xf32>
    %122 = arith.mulf %114, %121 : vector<4x32xf32>
    %123 = arith.addf %120, %122 : vector<4x32xf32>
    %c16_40 = arith.constant 16 : index
    %c0_41 = arith.constant 0 : index
    %124 = vector.load %arg14[%c16_40, %c0_41] : memref<32x32xf32, #tpu.memory_space<vmem>>, vector<4x32xf32>
    tpu.vector_store %arg14[%c16_40, %c0_41], %123 {strides = array<i32>} : memref<32x32xf32, #tpu.memory_space<vmem>>, vector<4x32xf32>,
    %c20 = arith.constant 20 : index
    %c0_42 = arith.constant 0 : index
    %125 = vector.load %arg13[%c20, %c0_42] : memref<32x96xf32, #tpu.memory_space<vmem>>, vector<4x96xf32>
    %cst_43 = arith.constant dense<0.000000e+00> : vector<4x96xf32>
    %126 = tpu.matmul %123, %8, %cst_43 {dimension_numbers = #tpu.dot_dimension_numbers<[1], [0], [0], [1], [0, 0, 1, 1], [], []>} : vector<4x32xf32>, vector<32x96xf32>, vector<4x96xf32> -> vector<4x96xf32>
    %127 = vector.extract_strided_slice %125 {offsets = [0, 0], sizes = [4, 64], strides = [1, 1]} : vector<4x96xf32> to vector<4x64xf32>
    %128 = vector.extract_strided_slice %126 {offsets = [0, 0], sizes = [4, 64], strides = [1, 1]} : vector<4x96xf32> to vector<4x64xf32>
    %129 = arith.addf %127, %128 : vector<4x64xf32>
    %130 = arith.negf %129 : vector<4x64xf32>
    %131 = math.exp %130 : vector<4x64xf32>
    %cst_44 = arith.constant 1.000000e+00 : f32
    %132 = vector.broadcast %cst_44 : f32 to vector<4x64xf32>
    %133 = arith.addf %132, %131 : vector<4x64xf32>
    %134 = arith.divf %132, %133 : vector<4x64xf32>
    %135 = vector.extract_strided_slice %134 {offsets = [0, 0], sizes = [4, 32], strides = [1, 1]} : vector<4x64xf32> to vector<4x32xf32>
    %136 = vector.extract_strided_slice %134 {offsets = [0, 32], sizes = [4, 32], strides = [1, 1]} : vector<4x64xf32> to vector<4x32xf32>
    %137 = vector.extract_strided_slice %125 {offsets = [0, 64], sizes = [4, 32], strides = [1, 1]} : vector<4x96xf32> to vector<4x32xf32>
    %138 = vector.extract_strided_slice %126 {offsets = [0, 64], sizes = [4, 32], strides = [1, 1]} : vector<4x96xf32> to vector<4x32xf32>
    %139 = arith.addf %138, %12 : vector<4x32xf32>
    %140 = arith.mulf %135, %139 : vector<4x32xf32>
    %141 = arith.addf %137, %140 : vector<4x32xf32>
    %142 = math.tanh %141 : vector<4x32xf32>
    %143 = arith.subf %123, %142 : vector<4x32xf32>
    %144 = arith.mulf %136, %143 : vector<4x32xf32>
    %145 = arith.addf %142, %144 : vector<4x32xf32>
    %c20_45 = arith.constant 20 : index
    %c0_46 = arith.constant 0 : index
    %146 = vector.load %arg14[%c20_45, %c0_46] : memref<32x32xf32, #tpu.memory_space<vmem>>, vector<4x32xf32>
    tpu.vector_store %arg14[%c20_45, %c0_46], %145 {strides = array<i32>} : memref<32x32xf32, #tpu.memory_space<vmem>>, vector<4x32xf32>,
    %c24 = arith.constant 24 : index
    %c0_47 = arith.constant 0 : index
    %147 = vector.load %arg13[%c24, %c0_47] : memref<32x96xf32, #tpu.memory_space<vmem>>, vector<4x96xf32>
    %cst_48 = arith.constant dense<0.000000e+00> : vector<4x96xf32>
    %148 = tpu.matmul %145, %8, %cst_48 {dimension_numbers = #tpu.dot_dimension_numbers<[1], [0], [0], [1], [0, 0, 1, 1], [], []>} : vector<4x32xf32>, vector<32x96xf32>, vector<4x96xf32> -> vector<4x96xf32>
    %149 = vector.extract_strided_slice %147 {offsets = [0, 0], sizes = [4, 64], strides = [1, 1]} : vector<4x96xf32> to vector<4x64xf32>
    %150 = vector.extract_strided_slice %148 {offsets = [0, 0], sizes = [4, 64], strides = [1, 1]} : vector<4x96xf32> to vector<4x64xf32>
    %151 = arith.addf %149, %150 : vector<4x64xf32>
    %152 = arith.negf %151 : vector<4x64xf32>
    %153 = math.exp %152 : vector<4x64xf32>
    %cst_49 = arith.constant 1.000000e+00 : f32
    %154 = vector.broadcast %cst_49 : f32 to vector<4x64xf32>
    %155 = arith.addf %154, %153 : vector<4x64xf32>
    %156 = arith.divf %154, %155 : vector<4x64xf32>
    %157 = vector.extract_strided_slice %156 {offsets = [0, 0], sizes = [4, 32], strides = [1, 1]} : vector<4x64xf32> to vector<4x32xf32>
    %158 = vector.extract_strided_slice %156 {offsets = [0, 32], sizes = [4, 32], strides = [1, 1]} : vector<4x64xf32> to vector<4x32xf32>
    %159 = vector.extract_strided_slice %147 {offsets = [0, 64], sizes = [4, 32], strides = [1, 1]} : vector<4x96xf32> to vector<4x32xf32>
    %160 = vector.extract_strided_slice %148 {offsets = [0, 64], sizes = [4, 32], strides = [1, 1]} : vector<4x96xf32> to vector<4x32xf32>
    %161 = arith.addf %160, %12 : vector<4x32xf32>
    %162 = arith.mulf %157, %161 : vector<4x32xf32>
    %163 = arith.addf %159, %162 : vector<4x32xf32>
    %164 = math.tanh %163 : vector<4x32xf32>
    %165 = arith.subf %145, %164 : vector<4x32xf32>
    %166 = arith.mulf %158, %165 : vector<4x32xf32>
    %167 = arith.addf %164, %166 : vector<4x32xf32>
    %c24_50 = arith.constant 24 : index
    %c0_51 = arith.constant 0 : index
    %168 = vector.load %arg14[%c24_50, %c0_51] : memref<32x32xf32, #tpu.memory_space<vmem>>, vector<4x32xf32>
    tpu.vector_store %arg14[%c24_50, %c0_51], %167 {strides = array<i32>} : memref<32x32xf32, #tpu.memory_space<vmem>>, vector<4x32xf32>,
    %c28 = arith.constant 28 : index
    %c0_52 = arith.constant 0 : index
    %169 = vector.load %arg13[%c28, %c0_52] : memref<32x96xf32, #tpu.memory_space<vmem>>, vector<4x96xf32>
    %cst_53 = arith.constant dense<0.000000e+00> : vector<4x96xf32>
    %170 = tpu.matmul %167, %8, %cst_53 {dimension_numbers = #tpu.dot_dimension_numbers<[1], [0], [0], [1], [0, 0, 1, 1], [], []>} : vector<4x32xf32>, vector<32x96xf32>, vector<4x96xf32> -> vector<4x96xf32>
    %171 = vector.extract_strided_slice %169 {offsets = [0, 0], sizes = [4, 64], strides = [1, 1]} : vector<4x96xf32> to vector<4x64xf32>
    %172 = vector.extract_strided_slice %170 {offsets = [0, 0], sizes = [4, 64], strides = [1, 1]} : vector<4x96xf32> to vector<4x64xf32>
    %173 = arith.addf %171, %172 : vector<4x64xf32>
    %174 = arith.negf %173 : vector<4x64xf32>
    %175 = math.exp %174 : vector<4x64xf32>
    %cst_54 = arith.constant 1.000000e+00 : f32
    %176 = vector.broadcast %cst_54 : f32 to vector<4x64xf32>
    %177 = arith.addf %176, %175 : vector<4x64xf32>
    %178 = arith.divf %176, %177 : vector<4x64xf32>
    %179 = vector.extract_strided_slice %178 {offsets = [0, 0], sizes = [4, 32], strides = [1, 1]} : vector<4x64xf32> to vector<4x32xf32>
    %180 = vector.extract_strided_slice %178 {offsets = [0, 32], sizes = [4, 32], strides = [1, 1]} : vector<4x64xf32> to vector<4x32xf32>
    %181 = vector.extract_strided_slice %169 {offsets = [0, 64], sizes = [4, 32], strides = [1, 1]} : vector<4x96xf32> to vector<4x32xf32>
    %182 = vector.extract_strided_slice %170 {offsets = [0, 64], sizes = [4, 32], strides = [1, 1]} : vector<4x96xf32> to vector<4x32xf32>
    %183 = arith.addf %182, %12 : vector<4x32xf32>
    %184 = arith.mulf %179, %183 : vector<4x32xf32>
    %185 = arith.addf %181, %184 : vector<4x32xf32>
    %186 = math.tanh %185 : vector<4x32xf32>
    %187 = arith.subf %167, %186 : vector<4x32xf32>
    %188 = arith.mulf %180, %187 : vector<4x32xf32>
    %189 = arith.addf %186, %188 : vector<4x32xf32>
    %c28_55 = arith.constant 28 : index
    %c0_56 = arith.constant 0 : index
    %190 = vector.load %arg14[%c28_55, %c0_56] : memref<32x32xf32, #tpu.memory_space<vmem>>, vector<4x32xf32>
    tpu.vector_store %arg14[%c28_55, %c0_56], %189 {strides = array<i32>} : memref<32x32xf32, #tpu.memory_space<vmem>>, vector<4x32xf32>,
    %c0_57 = arith.constant 0 : index
    %c0_58 = arith.constant 0 : index
    %191 = vector.load %arg14[%c0_57, %c0_58] : memref<32x32xf32, #tpu.memory_space<vmem>>, vector<32x32xf32>
    %c0_59 = arith.constant 0 : index
    %c0_60 = arith.constant 0 : index
    %192 = vector.load %arg6[%c0_59, %c0_60] : memref<32x96xf32, #tpu.memory_space<vmem>>, vector<32x96xf32>
    %cst_61 = arith.constant dense<0.000000e+00> : vector<32x96xf32>
    %193 = tpu.matmul %191, %192, %cst_61 {dimension_numbers = #tpu.dot_dimension_numbers<[1], [0], [0], [1], [0, 0, 1, 1], [], []>} : vector<32x32xf32>, vector<32x96xf32>, vector<32x96xf32> -> vector<32x96xf32>
    %c0_62 = arith.constant 0 : index
    %c0_63 = arith.constant 0 : index
    %194 = vector.load %arg8[%c0_62, %c0_63] : memref<1x96xf32, #tpu.memory_space<vmem>>, vector<1x96xf32>
    %195 = vector.broadcast %194 : vector<1x96xf32> to vector<32x96xf32>
    %196 = arith.addf %193, %195 : vector<32x96xf32>
    %c0_64 = arith.constant 0 : index
    %c0_65 = arith.constant 0 : index
    %197 = vector.load %arg13[%c0_64, %c0_65] : memref<32x96xf32, #tpu.memory_space<vmem>>, vector<32x96xf32>
    tpu.vector_store %arg13[%c0_64, %c0_65], %196 {strides = array<i32>} : memref<32x96xf32, #tpu.memory_space<vmem>>, vector<32x96xf32>,
    %c0_66 = arith.constant 0 : index
    %c0_67 = arith.constant 0 : index
    %c0_68 = arith.constant 0 : index
    %198 = vector.load %arg7[%c0_66, %c0_67, %c0_68] : memref<1x32x96xf32, #tpu.memory_space<vmem>>, vector<1x32x96xf32>
    %199 = vector.shape_cast %198 : vector<1x32x96xf32> to vector<32x96xf32>
    %c0_69 = arith.constant 0 : index
    %c0_70 = arith.constant 0 : index
    %c0_71 = arith.constant 0 : index
    %200 = vector.load %arg9[%c0_69, %c0_70, %c0_71] : memref<1x1x32xf32, #tpu.memory_space<vmem>>, vector<1x1x32xf32>
    %201 = vector.shape_cast %200 : vector<1x1x32xf32> to vector<1x32xf32>
    %202 = vector.shape_cast %201 : vector<1x32xf32> to vector<1x32xf32>
    %203 = vector.broadcast %202 : vector<1x32xf32> to vector<4x32xf32>
    %c1 = arith.constant 1 : index
    %c0_72 = arith.constant 0 : index
    %c0_73 = arith.constant 0 : index
    %204 = vector.load %arg1[%c1, %c0_72, %c0_73] : memref<2x4x32xf32, #tpu.memory_space<vmem>>, vector<1x4x32xf32>
    %205 = vector.shape_cast %204 : vector<1x4x32xf32> to vector<4x32xf32>
    %c0_74 = arith.constant 0 : index
    %c0_75 = arith.constant 0 : index
    %206 = vector.load %arg13[%c0_74, %c0_75] : memref<32x96xf32, #tpu.memory_space<vmem>>, vector<4x96xf32>
    %cst_76 = arith.constant dense<0.000000e+00> : vector<4x96xf32>
    %207 = tpu.matmul %205, %199, %cst_76 {dimension_numbers = #tpu.dot_dimension_numbers<[1], [0], [0], [1], [0, 0, 1, 1], [], []>} : vector<4x32xf32>, vector<32x96xf32>, vector<4x96xf32> -> vector<4x96xf32>
    %208 = vector.extract_strided_slice %206 {offsets = [0, 0], sizes = [4, 64], strides = [1, 1]} : vector<4x96xf32> to vector<4x64xf32>
    %209 = vector.extract_strided_slice %207 {offsets = [0, 0], sizes = [4, 64], strides = [1, 1]} : vector<4x96xf32> to vector<4x64xf32>
    %210 = arith.addf %208, %209 : vector<4x64xf32>
    %211 = arith.negf %210 : vector<4x64xf32>
    %212 = math.exp %211 : vector<4x64xf32>
    %cst_77 = arith.constant 1.000000e+00 : f32
    %213 = vector.broadcast %cst_77 : f32 to vector<4x64xf32>
    %214 = arith.addf %213, %212 : vector<4x64xf32>
    %215 = arith.divf %213, %214 : vector<4x64xf32>
    %216 = vector.extract_strided_slice %215 {offsets = [0, 0], sizes = [4, 32], strides = [1, 1]} : vector<4x64xf32> to vector<4x32xf32>
    %217 = vector.extract_strided_slice %215 {offsets = [0, 32], sizes = [4, 32], strides = [1, 1]} : vector<4x64xf32> to vector<4x32xf32>
    %218 = vector.extract_strided_slice %206 {offsets = [0, 64], sizes = [4, 32], strides = [1, 1]} : vector<4x96xf32> to vector<4x32xf32>
    %219 = vector.extract_strided_slice %207 {offsets = [0, 64], sizes = [4, 32], strides = [1, 1]} : vector<4x96xf32> to vector<4x32xf32>
    %220 = arith.addf %219, %203 : vector<4x32xf32>
    %221 = arith.mulf %216, %220 : vector<4x32xf32>
    %222 = arith.addf %218, %221 : vector<4x32xf32>
    %223 = math.tanh %222 : vector<4x32xf32>
    %224 = arith.subf %205, %223 : vector<4x32xf32>
    %225 = arith.mulf %217, %224 : vector<4x32xf32>
    %226 = arith.addf %223, %225 : vector<4x32xf32>
    %c0_78 = arith.constant 0 : index
    %c0_79 = arith.constant 0 : index
    %227 = vector.load %arg14[%c0_78, %c0_79] : memref<32x32xf32, #tpu.memory_space<vmem>>, vector<4x32xf32>
    tpu.vector_store %arg14[%c0_78, %c0_79], %226 {strides = array<i32>} : memref<32x32xf32, #tpu.memory_space<vmem>>, vector<4x32xf32>,
    %c4_80 = arith.constant 4 : index
    %c0_81 = arith.constant 0 : index
    %228 = vector.load %arg13[%c4_80, %c0_81] : memref<32x96xf32, #tpu.memory_space<vmem>>, vector<4x96xf32>
    %cst_82 = arith.constant dense<0.000000e+00> : vector<4x96xf32>
    %229 = tpu.matmul %226, %199, %cst_82 {dimension_numbers = #tpu.dot_dimension_numbers<[1], [0], [0], [1], [0, 0, 1, 1], [], []>} : vector<4x32xf32>, vector<32x96xf32>, vector<4x96xf32> -> vector<4x96xf32>
    %230 = vector.extract_strided_slice %228 {offsets = [0, 0], sizes = [4, 64], strides = [1, 1]} : vector<4x96xf32> to vector<4x64xf32>
    %231 = vector.extract_strided_slice %229 {offsets = [0, 0], sizes = [4, 64], strides = [1, 1]} : vector<4x96xf32> to vector<4x64xf32>
    %232 = arith.addf %230, %231 : vector<4x64xf32>
    %233 = arith.negf %232 : vector<4x64xf32>
    %234 = math.exp %233 : vector<4x64xf32>
    %cst_83 = arith.constant 1.000000e+00 : f32
    %235 = vector.broadcast %cst_83 : f32 to vector<4x64xf32>
    %236 = arith.addf %235, %234 : vector<4x64xf32>
    %237 = arith.divf %235, %236 : vector<4x64xf32>
    %238 = vector.extract_strided_slice %237 {offsets = [0, 0], sizes = [4, 32], strides = [1, 1]} : vector<4x64xf32> to vector<4x32xf32>
    %239 = vector.extract_strided_slice %237 {offsets = [0, 32], sizes = [4, 32], strides = [1, 1]} : vector<4x64xf32> to vector<4x32xf32>
    %240 = vector.extract_strided_slice %228 {offsets = [0, 64], sizes = [4, 32], strides = [1, 1]} : vector<4x96xf32> to vector<4x32xf32>
    %241 = vector.extract_strided_slice %229 {offsets = [0, 64], sizes = [4, 32], strides = [1, 1]} : vector<4x96xf32> to vector<4x32xf32>
    %242 = arith.addf %241, %203 : vector<4x32xf32>
    %243 = arith.mulf %238, %242 : vector<4x32xf32>
    %244 = arith.addf %240, %243 : vector<4x32xf32>
    %245 = math.tanh %244 : vector<4x32xf32>
    %246 = arith.subf %226, %245 : vector<4x32xf32>
    %247 = arith.mulf %239, %246 : vector<4x32xf32>
    %248 = arith.addf %245, %247 : vector<4x32xf32>
    %c4_84 = arith.constant 4 : index
    %c0_85 = arith.constant 0 : index
    %249 = vector.load %arg14[%c4_84, %c0_85] : memref<32x32xf32, #tpu.memory_space<vmem>>, vector<4x32xf32>
    tpu.vector_store %arg14[%c4_84, %c0_85], %248 {strides = array<i32>} : memref<32x32xf32, #tpu.memory_space<vmem>>, vector<4x32xf32>,
    %c8_86 = arith.constant 8 : index
    %c0_87 = arith.constant 0 : index
    %250 = vector.load %arg13[%c8_86, %c0_87] : memref<32x96xf32, #tpu.memory_space<vmem>>, vector<4x96xf32>
    %cst_88 = arith.constant dense<0.000000e+00> : vector<4x96xf32>
    %251 = tpu.matmul %248, %199, %cst_88 {dimension_numbers = #tpu.dot_dimension_numbers<[1], [0], [0], [1], [0, 0, 1, 1], [], []>} : vector<4x32xf32>, vector<32x96xf32>, vector<4x96xf32> -> vector<4x96xf32>
    %252 = vector.extract_strided_slice %250 {offsets = [0, 0], sizes = [4, 64], strides = [1, 1]} : vector<4x96xf32> to vector<4x64xf32>
    %253 = vector.extract_strided_slice %251 {offsets = [0, 0], sizes = [4, 64], strides = [1, 1]} : vector<4x96xf32> to vector<4x64xf32>
    %254 = arith.addf %252, %253 : vector<4x64xf32>
    %255 = arith.negf %254 : vector<4x64xf32>
    %256 = math.exp %255 : vector<4x64xf32>
    %cst_89 = arith.constant 1.000000e+00 : f32
    %257 = vector.broadcast %cst_89 : f32 to vector<4x64xf32>
    %258 = arith.addf %257, %256 : vector<4x64xf32>
    %259 = arith.divf %257, %258 : vector<4x64xf32>
    %260 = vector.extract_strided_slice %259 {offsets = [0, 0], sizes = [4, 32], strides = [1, 1]} : vector<4x64xf32> to vector<4x32xf32>
    %261 = vector.extract_strided_slice %259 {offsets = [0, 32], sizes = [4, 32], strides = [1, 1]} : vector<4x64xf32> to vector<4x32xf32>
    %262 = vector.extract_strided_slice %250 {offsets = [0, 64], sizes = [4, 32], strides = [1, 1]} : vector<4x96xf32> to vector<4x32xf32>
    %263 = vector.extract_strided_slice %251 {offsets = [0, 64], sizes = [4, 32], strides = [1, 1]} : vector<4x96xf32> to vector<4x32xf32>
    %264 = arith.addf %263, %203 : vector<4x32xf32>
    %265 = arith.mulf %260, %264 : vector<4x32xf32>
    %266 = arith.addf %262, %265 : vector<4x32xf32>
    %267 = math.tanh %266 : vector<4x32xf32>
    %268 = arith.subf %248, %267 : vector<4x32xf32>
    %269 = arith.mulf %261, %268 : vector<4x32xf32>
    %270 = arith.addf %267, %269 : vector<4x32xf32>
    %c8_90 = arith.constant 8 : index
    %c0_91 = arith.constant 0 : index
    %271 = vector.load %arg14[%c8_90, %c0_91] : memref<32x32xf32, #tpu.memory_space<vmem>>, vector<4x32xf32>
    tpu.vector_store %arg14[%c8_90, %c0_91], %270 {strides = array<i32>} : memref<32x32xf32, #tpu.memory_space<vmem>>, vector<4x32xf32>,
    %c12_92 = arith.constant 12 : index
    %c0_93 = arith.constant 0 : index
    %272 = vector.load %arg13[%c12_92, %c0_93] : memref<32x96xf32, #tpu.memory_space<vmem>>, vector<4x96xf32>
    %cst_94 = arith.constant dense<0.000000e+00> : vector<4x96xf32>
    %273 = tpu.matmul %270, %199, %cst_94 {dimension_numbers = #tpu.dot_dimension_numbers<[1], [0], [0], [1], [0, 0, 1, 1], [], []>} : vector<4x32xf32>, vector<32x96xf32>, vector<4x96xf32> -> vector<4x96xf32>
    %274 = vector.extract_strided_slice %272 {offsets = [0, 0], sizes = [4, 64], strides = [1, 1]} : vector<4x96xf32> to vector<4x64xf32>
    %275 = vector.extract_strided_slice %273 {offsets = [0, 0], sizes = [4, 64], strides = [1, 1]} : vector<4x96xf32> to vector<4x64xf32>
    %276 = arith.addf %274, %275 : vector<4x64xf32>
    %277 = arith.negf %276 : vector<4x64xf32>
    %278 = math.exp %277 : vector<4x64xf32>
    %cst_95 = arith.constant 1.000000e+00 : f32
    %279 = vector.broadcast %cst_95 : f32 to vector<4x64xf32>
    %280 = arith.addf %279, %278 : vector<4x64xf32>
    %281 = arith.divf %279, %280 : vector<4x64xf32>
    %282 = vector.extract_strided_slice %281 {offsets = [0, 0], sizes = [4, 32], strides = [1, 1]} : vector<4x64xf32> to vector<4x32xf32>
    %283 = vector.extract_strided_slice %281 {offsets = [0, 32], sizes = [4, 32], strides = [1, 1]} : vector<4x64xf32> to vector<4x32xf32>
    %284 = vector.extract_strided_slice %272 {offsets = [0, 64], sizes = [4, 32], strides = [1, 1]} : vector<4x96xf32> to vector<4x32xf32>
    %285 = vector.extract_strided_slice %273 {offsets = [0, 64], sizes = [4, 32], strides = [1, 1]} : vector<4x96xf32> to vector<4x32xf32>
    %286 = arith.addf %285, %203 : vector<4x32xf32>
    %287 = arith.mulf %282, %286 : vector<4x32xf32>
    %288 = arith.addf %284, %287 : vector<4x32xf32>
    %289 = math.tanh %288 : vector<4x32xf32>
    %290 = arith.subf %270, %289 : vector<4x32xf32>
    %291 = arith.mulf %283, %290 : vector<4x32xf32>
    %292 = arith.addf %289, %291 : vector<4x32xf32>
    %c12_96 = arith.constant 12 : index
    %c0_97 = arith.constant 0 : index
    %293 = vector.load %arg14[%c12_96, %c0_97] : memref<32x32xf32, #tpu.memory_space<vmem>>, vector<4x32xf32>
    tpu.vector_store %arg14[%c12_96, %c0_97], %292 {strides = array<i32>} : memref<32x32xf32, #tpu.memory_space<vmem>>, vector<4x32xf32>,
    %c16_98 = arith.constant 16 : index
    %c0_99 = arith.constant 0 : index
    %294 = vector.load %arg13[%c16_98, %c0_99] : memref<32x96xf32, #tpu.memory_space<vmem>>, vector<4x96xf32>
    %cst_100 = arith.constant dense<0.000000e+00> : vector<4x96xf32>
    %295 = tpu.matmul %292, %199, %cst_100 {dimension_numbers = #tpu.dot_dimension_numbers<[1], [0], [0], [1], [0, 0, 1, 1], [], []>} : vector<4x32xf32>, vector<32x96xf32>, vector<4x96xf32> -> vector<4x96xf32>
    %296 = vector.extract_strided_slice %294 {offsets = [0, 0], sizes = [4, 64], strides = [1, 1]} : vector<4x96xf32> to vector<4x64xf32>
    %297 = vector.extract_strided_slice %295 {offsets = [0, 0], sizes = [4, 64], strides = [1, 1]} : vector<4x96xf32> to vector<4x64xf32>
    %298 = arith.addf %296, %297 : vector<4x64xf32>
    %299 = arith.negf %298 : vector<4x64xf32>
    %300 = math.exp %299 : vector<4x64xf32>
    %cst_101 = arith.constant 1.000000e+00 : f32
    %301 = vector.broadcast %cst_101 : f32 to vector<4x64xf32>
    %302 = arith.addf %301, %300 : vector<4x64xf32>
    %303 = arith.divf %301, %302 : vector<4x64xf32>
    %304 = vector.extract_strided_slice %303 {offsets = [0, 0], sizes = [4, 32], strides = [1, 1]} : vector<4x64xf32> to vector<4x32xf32>
    %305 = vector.extract_strided_slice %303 {offsets = [0, 32], sizes = [4, 32], strides = [1, 1]} : vector<4x64xf32> to vector<4x32xf32>
    %306 = vector.extract_strided_slice %294 {offsets = [0, 64], sizes = [4, 32], strides = [1, 1]} : vector<4x96xf32> to vector<4x32xf32>
    %307 = vector.extract_strided_slice %295 {offsets = [0, 64], sizes = [4, 32], strides = [1, 1]} : vector<4x96xf32> to vector<4x32xf32>
    %308 = arith.addf %307, %203 : vector<4x32xf32>
    %309 = arith.mulf %304, %308 : vector<4x32xf32>
    %310 = arith.addf %306, %309 : vector<4x32xf32>
    %311 = math.tanh %310 : vector<4x32xf32>
    %312 = arith.subf %292, %311 : vector<4x32xf32>
    %313 = arith.mulf %305, %312 : vector<4x32xf32>
    %314 = arith.addf %311, %313 : vector<4x32xf32>
    %c16_102 = arith.constant 16 : index
    %c0_103 = arith.constant 0 : index
    %315 = vector.load %arg14[%c16_102, %c0_103] : memref<32x32xf32, #tpu.memory_space<vmem>>, vector<4x32xf32>
    tpu.vector_store %arg14[%c16_102, %c0_103], %314 {strides = array<i32>} : memref<32x32xf32, #tpu.memory_space<vmem>>, vector<4x32xf32>,
    %c20_104 = arith.constant 20 : index
    %c0_105 = arith.constant 0 : index
    %316 = vector.load %arg13[%c20_104, %c0_105] : memref<32x96xf32, #tpu.memory_space<vmem>>, vector<4x96xf32>
    %cst_106 = arith.constant dense<0.000000e+00> : vector<4x96xf32>
    %317 = tpu.matmul %314, %199, %cst_106 {dimension_numbers = #tpu.dot_dimension_numbers<[1], [0], [0], [1], [0, 0, 1, 1], [], []>} : vector<4x32xf32>, vector<32x96xf32>, vector<4x96xf32> -> vector<4x96xf32>
    %318 = vector.extract_strided_slice %316 {offsets = [0, 0], sizes = [4, 64], strides = [1, 1]} : vector<4x96xf32> to vector<4x64xf32>
    %319 = vector.extract_strided_slice %317 {offsets = [0, 0], sizes = [4, 64], strides = [1, 1]} : vector<4x96xf32> to vector<4x64xf32>
    %320 = arith.addf %318, %319 : vector<4x64xf32>
    %321 = arith.negf %320 : vector<4x64xf32>
    %322 = math.exp %321 : vector<4x64xf32>
    %cst_107 = arith.constant 1.000000e+00 : f32
    %323 = vector.broadcast %cst_107 : f32 to vector<4x64xf32>
    %324 = arith.addf %323, %322 : vector<4x64xf32>
    %325 = arith.divf %323, %324 : vector<4x64xf32>
    %326 = vector.extract_strided_slice %325 {offsets = [0, 0], sizes = [4, 32], strides = [1, 1]} : vector<4x64xf32> to vector<4x32xf32>
    %327 = vector.extract_strided_slice %325 {offsets = [0, 32], sizes = [4, 32], strides = [1, 1]} : vector<4x64xf32> to vector<4x32xf32>
    %328 = vector.extract_strided_slice %316 {offsets = [0, 64], sizes = [4, 32], strides = [1, 1]} : vector<4x96xf32> to vector<4x32xf32>
    %329 = vector.extract_strided_slice %317 {offsets = [0, 64], sizes = [4, 32], strides = [1, 1]} : vector<4x96xf32> to vector<4x32xf32>
    %330 = arith.addf %329, %203 : vector<4x32xf32>
    %331 = arith.mulf %326, %330 : vector<4x32xf32>
    %332 = arith.addf %328, %331 : vector<4x32xf32>
    %333 = math.tanh %332 : vector<4x32xf32>
    %334 = arith.subf %314, %333 : vector<4x32xf32>
    %335 = arith.mulf %327, %334 : vector<4x32xf32>
    %336 = arith.addf %333, %335 : vector<4x32xf32>
    %c20_108 = arith.constant 20 : index
    %c0_109 = arith.constant 0 : index
    %337 = vector.load %arg14[%c20_108, %c0_109] : memref<32x32xf32, #tpu.memory_space<vmem>>, vector<4x32xf32>
    tpu.vector_store %arg14[%c20_108, %c0_109], %336 {strides = array<i32>} : memref<32x32xf32, #tpu.memory_space<vmem>>, vector<4x32xf32>,
    %c24_110 = arith.constant 24 : index
    %c0_111 = arith.constant 0 : index
    %338 = vector.load %arg13[%c24_110, %c0_111] : memref<32x96xf32, #tpu.memory_space<vmem>>, vector<4x96xf32>
    %cst_112 = arith.constant dense<0.000000e+00> : vector<4x96xf32>
    %339 = tpu.matmul %336, %199, %cst_112 {dimension_numbers = #tpu.dot_dimension_numbers<[1], [0], [0], [1], [0, 0, 1, 1], [], []>} : vector<4x32xf32>, vector<32x96xf32>, vector<4x96xf32> -> vector<4x96xf32>
    %340 = vector.extract_strided_slice %338 {offsets = [0, 0], sizes = [4, 64], strides = [1, 1]} : vector<4x96xf32> to vector<4x64xf32>
    %341 = vector.extract_strided_slice %339 {offsets = [0, 0], sizes = [4, 64], strides = [1, 1]} : vector<4x96xf32> to vector<4x64xf32>
    %342 = arith.addf %340, %341 : vector<4x64xf32>
    %343 = arith.negf %342 : vector<4x64xf32>
    %344 = math.exp %343 : vector<4x64xf32>
    %cst_113 = arith.constant 1.000000e+00 : f32
    %345 = vector.broadcast %cst_113 : f32 to vector<4x64xf32>
    %346 = arith.addf %345, %344 : vector<4x64xf32>
    %347 = arith.divf %345, %346 : vector<4x64xf32>
    %348 = vector.extract_strided_slice %347 {offsets = [0, 0], sizes = [4, 32], strides = [1, 1]} : vector<4x64xf32> to vector<4x32xf32>
    %349 = vector.extract_strided_slice %347 {offsets = [0, 32], sizes = [4, 32], strides = [1, 1]} : vector<4x64xf32> to vector<4x32xf32>
    %350 = vector.extract_strided_slice %338 {offsets = [0, 64], sizes = [4, 32], strides = [1, 1]} : vector<4x96xf32> to vector<4x32xf32>
    %351 = vector.extract_strided_slice %339 {offsets = [0, 64], sizes = [4, 32], strides = [1, 1]} : vector<4x96xf32> to vector<4x32xf32>
    %352 = arith.addf %351, %203 : vector<4x32xf32>
    %353 = arith.mulf %348, %352 : vector<4x32xf32>
    %354 = arith.addf %350, %353 : vector<4x32xf32>
    %355 = math.tanh %354 : vector<4x32xf32>
    %356 = arith.subf %336, %355 : vector<4x32xf32>
    %357 = arith.mulf %349, %356 : vector<4x32xf32>
    %358 = arith.addf %355, %357 : vector<4x32xf32>
    %c24_114 = arith.constant 24 : index
    %c0_115 = arith.constant 0 : index
    %359 = vector.load %arg14[%c24_114, %c0_115] : memref<32x32xf32, #tpu.memory_space<vmem>>, vector<4x32xf32>
    tpu.vector_store %arg14[%c24_114, %c0_115], %358 {strides = array<i32>} : memref<32x32xf32, #tpu.memory_space<vmem>>, vector<4x32xf32>,
    %c28_116 = arith.constant 28 : index
    %c0_117 = arith.constant 0 : index
    %360 = vector.load %arg13[%c28_116, %c0_117] : memref<32x96xf32, #tpu.memory_space<vmem>>, vector<4x96xf32>
    %cst_118 = arith.constant dense<0.000000e+00> : vector<4x96xf32>
    %361 = tpu.matmul %358, %199, %cst_118 {dimension_numbers = #tpu.dot_dimension_numbers<[1], [0], [0], [1], [0, 0, 1, 1], [], []>} : vector<4x32xf32>, vector<32x96xf32>, vector<4x96xf32> -> vector<4x96xf32>
    %362 = vector.extract_strided_slice %360 {offsets = [0, 0], sizes = [4, 64], strides = [1, 1]} : vector<4x96xf32> to vector<4x64xf32>
    %363 = vector.extract_strided_slice %361 {offsets = [0, 0], sizes = [4, 64], strides = [1, 1]} : vector<4x96xf32> to vector<4x64xf32>
    %364 = arith.addf %362, %363 : vector<4x64xf32>
    %365 = arith.negf %364 : vector<4x64xf32>
    %366 = math.exp %365 : vector<4x64xf32>
    %cst_119 = arith.constant 1.000000e+00 : f32
    %367 = vector.broadcast %cst_119 : f32 to vector<4x64xf32>
    %368 = arith.addf %367, %366 : vector<4x64xf32>
    %369 = arith.divf %367, %368 : vector<4x64xf32>
    %370 = vector.extract_strided_slice %369 {offsets = [0, 0], sizes = [4, 32], strides = [1, 1]} : vector<4x64xf32> to vector<4x32xf32>
    %371 = vector.extract_strided_slice %369 {offsets = [0, 32], sizes = [4, 32], strides = [1, 1]} : vector<4x64xf32> to vector<4x32xf32>
    %372 = vector.extract_strided_slice %360 {offsets = [0, 64], sizes = [4, 32], strides = [1, 1]} : vector<4x96xf32> to vector<4x32xf32>
    %373 = vector.extract_strided_slice %361 {offsets = [0, 64], sizes = [4, 32], strides = [1, 1]} : vector<4x96xf32> to vector<4x32xf32>
    %374 = arith.addf %373, %203 : vector<4x32xf32>
    %375 = arith.mulf %370, %374 : vector<4x32xf32>
    %376 = arith.addf %372, %375 : vector<4x32xf32>
    %377 = math.tanh %376 : vector<4x32xf32>
    %378 = arith.subf %358, %377 : vector<4x32xf32>
    %379 = arith.mulf %371, %378 : vector<4x32xf32>
    %380 = arith.addf %377, %379 : vector<4x32xf32>
    %c28_120 = arith.constant 28 : index
    %c0_121 = arith.constant 0 : index
    %381 = vector.load %arg14[%c28_120, %c0_121] : memref<32x32xf32, #tpu.memory_space<vmem>>, vector<4x32xf32>
    tpu.vector_store %arg14[%c28_120, %c0_121], %380 {strides = array<i32>} : memref<32x32xf32, #tpu.memory_space<vmem>>, vector<4x32xf32>,
    %c28_122 = arith.constant 28 : index
    %c0_123 = arith.constant 0 : index
    %382 = vector.load %arg14[%c28_122, %c0_123] : memref<32x32xf32, #tpu.memory_space<vmem>>, vector<4x32xf32>
    %c0_124 = arith.constant 0 : index
    %c0_125 = arith.constant 0 : index
    %383 = vector.load %arg10[%c0_124, %c0_125] : memref<32x10xf32, #tpu.memory_space<vmem>>, vector<32x10xf32>
    %cst_126 = arith.constant dense<0.000000e+00> : vector<4x10xf32>
    %384 = tpu.matmul %382, %383, %cst_126 {dimension_numbers = #tpu.dot_dimension_numbers<[1], [0], [0], [1], [0, 0, 1, 1], [], []>} : vector<4x32xf32>, vector<32x10xf32>, vector<4x10xf32> -> vector<4x10xf32>
    %c0_127 = arith.constant 0 : index
    %c0_128 = arith.constant 0 : index
    %385 = vector.load %arg11[%c0_127, %c0_128] : memref<1x10xf32, #tpu.memory_space<vmem>>, vector<1x10xf32>
    %386 = vector.broadcast %385 : vector<1x10xf32> to vector<4x10xf32>
    %387 = arith.addf %384, %386 : vector<4x10xf32>
    %c0_129 = arith.constant 0 : index
    %c0_130 = arith.constant 0 : index
    %388 = vector.load %arg12[%c0_129, %c0_130] : memref<4x10xf32, #tpu.memory_space<vmem>>, vector<4x10xf32>
    tpu.vector_store %arg12[%c0_129, %c0_130], %387 {strides = array<i32>} : memref<4x10xf32, #tpu.memory_space<vmem>>, vector<4x10xf32>,
    return
  }
}

</mosaic_0001>

<bundles_post_ra>
// kernel: gru_forward.1
= control target key start
LH: loop header
LB: loop body
LE: loop exit
PB: predicated region body
PF: predicated region fallthrough
CT: control target
= control target key end

     0   :  { %17 = vsyncpa [#allocation5], 0  ;;  %s3482_s0 = inlined_call_operand.vmem [shape: f32[32,64], index: 0, kind: input, shape index: {}]   ;;  %s3483_s1 = inlined_call_operand.hbm [shape: f32[2,4,32], index: 1, kind: input, shape index: {}]   ;;  %s3484_s2 = inlined_call_operand.hbm [shape: f32[64,96], index: 2, kind: input, shape index: {}]   ;;  %s3485_s3 = inlined_call_operand.vmem [shape: f32[1,32,96], index: 3, kind: input, shape index: {}]   ;;  %s3486_s4 = inlined_call_operand.hbm [shape: f32[1,96], index: 4, kind: input, shape index: {}]   ;;  %s3487_s5 = inlined_call_operand.hbm [shape: f32[1,1,32], index: 5, kind: input, shape index: {}]   ;;  %s3488_s6 = inlined_call_operand.hbm [shape: f32[32,96], index: 6, kind: input, shape index: {}]   ;;  %s3489_s7 = inlined_call_operand.hbm [shape: f32[1,32,96], index: 7, kind: input, shape index: {}]   ;;  %s3490_s8 = inlined_call_operand.hbm [shape: f32[1,96], index: 8, kind: input, shape index: {}]   ;;  %s3491_s9 = inlined_call_operand.hbm [shape: f32[1,1,32], index: 9, kind: input, shape index: {}]   ;;  %s3492_s10 = inlined_call_operand.vmem [shape: f32[32,10], index: 10, kind: input, shape index: {}]   ;;  %s3493_s11 = inlined_call_operand.hbm [shape: f32[1,10], index: 11, kind: input, shape index: {}]   ;;  %s3494_s12 = inlined_call_operand.hbm [shape: f32[4,10], index: 12, kind: output, shape index: {}]  }
   0x1   :  { %18 = vsyncpa [#allocation8], 0 }
   0x2   :  { %19 = vsyncpa [#allocation11], 0 }
   0x3   :  { %20 = vsyncpa [#allocation14], 0 }
   0x4   :  { %21 = vsyncpa [#allocation17], 0 }
   0x5   :  { %22 = vsyncpa [#allocation6], 0  ;;  %s2967_s21 = smov [#allocation7]  }
   0x6   :  { %s42_s22 = sshll.u32 %s2967_s21, 4  ;;  %s43_s22 = int_to_ptr.vmem [resolvable:$true] %s42_s22 }
   0x7   :  { %s2763_s23 = scalar_lea.vmem %s43_s22, 1024  ;;  %p2768_p1 = scmp.lt.s32.totalorder %s43_s22, %s43_s22 }
   0x8   :  { %p2764_p0 = scmp.ne.s32.totalorder %s43_s22, %s2763_s23  ;;  %p2769_p2 = scmp.lt.s32.totalorder %s2763_s23, %s2763_s23 }
   0xa   :  { %p2770_p3 = por %p2769_p2, %p2768_p1 }
   0xc   :  { %p2771_p4 = pnand %p2770_p3, %p2764_p0 }
   0xe   :  { %2774 = shalt.err (!%p2771_p4)
}
   0xf   :  { %s2968_s24 = smov 128   ;;  %s2969_s25 = smov 8  }
  0x10   :  { %48 = dma.hbm_to_vmem [thread:$0]  %s3484_s2, 1024, %s43_s22, [#allocation8], %s2968_s24, %s2968_s24, %s2969_s25  }
  0x11   :  { %s2970_s28 = smov [#allocation10]   ;;  %s2971_s30 = smov [#allocation13]  }
  0x12   :  { %s67_s29 = sshll.u32 %s2970_s28, 4  ;;  %s88_s13 = sshll.u32 %s2971_s30, 4  ;;  %s68_s29 = int_to_ptr.vmem [resolvable:$true] %s67_s29  ;;  %s89_s13 = int_to_ptr.vmem [resolvable:$true] %s88_s13 }
  0x13   :  { %s2783_s14 = scalar_lea.vmem %s68_s29, 16  ;;  %s2787_s15 = scalar_lea.vmem %s68_s29, 32 }
  0x14   :  { %p2784_p5 = scmp.ne.s32.totalorder %s68_s29, %s2783_s14  ;;  %p2788_p6 = scmp.lt.s32.totalorder %s68_s29, %s68_s29 }
  0x15   :  { %p2789_p7 = scmp.lt.s32.totalorder %s2787_s15, %s2783_s14 }
  0x17   :  { %p2790_p8 = por %p2789_p7, %p2788_p6 }
  0x19   :  { %p2791_p9 = pnand %p2790_p8, %p2784_p5 }
  0x1b   :  { %2794 = shalt.err (!%p2791_p9)
}
  0x1c   :  { %70 = dma.hbm_to_vmem [thread:$0]  %s3487_s5, 16, %s68_s29, [#allocation11]  }
  0x1d   :  { %s2803_s18 = scalar_lea.vmem %s89_s13, 512  ;;  %p2808_p11 = scmp.lt.s32.totalorder %s89_s13, %s89_s13 }
  0x1e   :  { %p2804_p10 = scmp.ne.s32.totalorder %s89_s13, %s2803_s18  ;;  %p2809_p12 = scmp.lt.s32.totalorder %s2803_s18, %s2803_s18 }
  0x20   :  { %p2810_p13 = por %p2809_p12, %p2808_p11 }
  0x22   :  { %p2811_p0 = pnand %p2810_p13, %p2804_p10 }
  0x24   :  { %2814 = shalt.err (!%p2811_p0)
}
  0x25   :  { %94 = dma.hbm_to_vmem [thread:$0]  %s3489_s7, 512, %s89_s13, [#allocation14], %s2968_s24, %s2968_s24, %s2969_s25  }
  0x26   :  { %s2972_s20 = smov [#allocation16]   ;;  %s2973_s22 = smov [#allocation4]  }
  0x27   :  { %s111_s21 = sshll.u32 %s2972_s20, 4  ;;  %s30_s5 = sshll.u32 %s2973_s22, 4  ;;  %s112_s21 = int_to_ptr.vmem [resolvable:$true] %s111_s21  ;;  %s31_s5 = int_to_ptr.vmem [resolvable:$true] %s30_s5 }
  0x28   :  { %s2823_s23 = scalar_lea.vmem %s112_s21, 16  ;;  %s2827_s26 = scalar_lea.vmem %s112_s21, 32 }
  0x29   :  { %p2824_p1 = scmp.ne.s32.totalorder %s112_s21, %s2823_s23  ;;  %p2828_p2 = scmp.lt.s32.totalorder %s112_s21, %s112_s21 }
  0x2a   :  { %p2829_p3 = scmp.lt.s32.totalorder %s2827_s26, %s2823_s23 }
  0x2c   :  { %p2830_p4 = por %p2829_p3, %p2828_p2 }
  0x2e   :  { %p2831_p5 = pnand %p2830_p4, %p2824_p1 }
  0x30   :  { %2834 = shalt.err (!%p2831_p5)
}
  0x31   :  { %114 = dma.hbm_to_vmem [thread:$0]  %s3491_s9, 16, %s112_s21, [#allocation17]  }
  0x32   :  { %s2843_s29 = scalar_lea.vmem %s31_s5, 128  ;;  %p2848_p7 = scmp.lt.s32.totalorder %s31_s5, %s31_s5 }
  0x33   :  { %p2844_p6 = scmp.ne.s32.totalorder %s31_s5, %s2843_s29  ;;  %p2849_p8 = scmp.lt.s32.totalorder %s2843_s29, %s2843_s29 }
  0x35   :  { %p2850_p9 = por %p2849_p8, %p2848_p7 }
  0x37   :  { %p2851_p10 = pnand %p2850_p9, %p2844_p6 }
  0x39   :  { %2854 = shalt.err (!%p2851_p10)
}
  0x3a   :  { %s2974_s7 = smov 64   ;;  %s2975_s30 = smov 4  }
  0x3b   :  { %36 = dma.hbm_to_vmem [thread:$0]  %s3483_s1, 128, %s31_s5, [#allocation5], %s2974_s7, %s2974_s7, %s2975_s30  }
  0x3c   :  { %s2976_s15 = smov [#allocation9]   ;;  %s2977_s9 = smov [#allocation12]  }
  0x3d   :  { %s57_s16 = sshll.u32 %s2976_s15, 4  ;;  %s76_s17 = sshll.u32 %s2977_s9, 4  ;;  %s58_s16 = int_to_ptr.vmem [resolvable:$true] %s57_s16  ;;  %s77_s17 = int_to_ptr.vmem [resolvable:$true] %s76_s17 }
  0x3e   :  { %s2863_s18 = scalar_lea.vmem %s58_s16, 16  ;;  %s2867_s2 = scalar_lea.vmem %s58_s16, 32 }
  0x3f   :  { %p2864_p11 = scmp.ne.s32.totalorder %s58_s16, %s2863_s18  ;;  %p2868_p12 = scmp.lt.s32.totalorder %s58_s16, %s58_s16 }
  0x40   :  { %p2869_p13 = scmp.lt.s32.totalorder %s2867_s2, %s2863_s18 }
  0x42   :  { %p2870_p0 = por %p2869_p13, %p2868_p12 }
  0x44   :  { %p2871_p1 = pnand %p2870_p0, %p2864_p11 }
  0x46   :  { %2874 = shalt.err (!%p2871_p1)
}
  0x47   :  { %60 = dma.hbm_to_vmem [thread:$0]  %s3486_s4, 16, %s58_s16, [#allocation8]  }
  0x48   :  { %s2883_s21 = scalar_lea.vmem %s77_s17, 512  ;;  %p2888_p3 = scmp.lt.s32.totalorder %s77_s17, %s77_s17 }
  0x49   :  { %p2884_p2 = scmp.ne.s32.totalorder %s77_s17, %s2883_s21  ;;  %p2889_p4 = scmp.lt.s32.totalorder %s2883_s21, %s2883_s21 }
  0x4b   :  { %p2890_p5 = por %p2889_p4, %p2888_p3 }
  0x4d   :  { %p2891_p6 = pnand %p2890_p5, %p2884_p2 }
  0x4f   :  { %2894 = shalt.err (!%p2891_p6)
}
  0x50   :  { %82 = dma.hbm_to_vmem [thread:$0]  %s3488_s6, 512, %s77_s17, [#allocation11], %s2968_s24, %s2968_s24, %s2969_s25  }
  0x51   :  { %s2978_s5 = smov [#allocation15]   ;;  %s2979_s26 = smov [#allocation18]  }
  0x52   :  { %s101_s23 = sshll.u32 %s2978_s5, 4  ;;  %s123_s4 = sshll.u32 %s2979_s26, 4  ;;  %s102_s23 = int_to_ptr.vmem [resolvable:$true] %s101_s23  ;;  %s124_s4 = int_to_ptr.vmem [resolvable:$true] %s123_s4 }
  0x53   :  { %s2903_s27 = scalar_lea.vmem %s102_s23, 16  ;;  %s2907_s28 = scalar_lea.vmem %s102_s23, 32 }
  0x54   :  { %p2904_p7 = scmp.ne.s32.totalorder %s102_s23, %s2903_s27  ;;  %p2908_p8 = scmp.lt.s32.totalorder %s102_s23, %s102_s23 }
  0x55   :  { %p2909_p9 = scmp.lt.s32.totalorder %s2907_s28, %s2903_s27 }
  0x57   :  { %p2910_p10 = por %p2909_p9, %p2908_p8 }
  0x59   :  { %p2911_p11 = pnand %p2910_p10, %p2904_p7 }
  0x5b   :  { %2914 = shalt.err (!%p2911_p11)
}
  0x5c   :  { %104 = dma.hbm_to_vmem [thread:$0]  %s3490_s8, 16, %s102_s23, [#allocation14]  }
  0x5d   :  { %s2923_s13 = scalar_lea.vmem %s124_s4, 16  ;;  %s2927_s6 = scalar_lea.vmem %s124_s4, 32 }
  0x5e   :  { %p2924_p12 = scmp.ne.s32.totalorder %s124_s4, %s2923_s13  ;;  %p2928_p13 = scmp.lt.s32.totalorder %s124_s4, %s124_s4 }
  0x5f   :  { %p2929_p0 = scmp.lt.s32.totalorder %s2927_s6, %s2923_s13 }
  0x61   :  { %p2930_p1 = por %p2929_p0, %p2928_p13 }
  0x63   :  { %p2931_p2 = pnand %p2930_p1, %p2924_p12 }
  0x65   :  { %2934 = shalt.err (!%p2931_p2)
}
  0x66   :  { %126 = dma.hbm_to_vmem [thread:$0]  %s3493_s11, 16, %s124_s4, [#allocation17]  }
  0x67   :  { %2955 = dma.done.wait [#allocation5], 128  }
  0x68   :  { %2956 = vsyncadd [#allocation5], 4294967168 }
  0x69   :  { %2957 = dma.done.wait [#allocation8], 1040  }
  0x6a   :  { %2958 = vsyncadd [#allocation8], 4294966256 }
  0x6b   :  { %2959 = dma.done.wait [#allocation11], 528  }
  0x6c   :  { %2960 = vsyncadd [#allocation11], 4294966768 }
  0x6d   :  { %2961 = dma.done.wait [#allocation14], 528  }
  0x6e   :  { %2962 = vsyncadd [#allocation14], 4294966768 }
  0x6f   :  { %2963 = dma.done.wait [#allocation17], 32  }
  0x70   :  { %2964 = vsyncadd [#allocation17], 4294967264  ;;  %v2980_v0 = vmov 0.0   ;;  %vm2981_vm0 = vmmov 0   ;;  %v165_v1 = vld [vmem:[#allocation7 + $0x38] sm:$0xff]  ;;  %v3094_v2 = vld [vmem:[%s3485_s3 + $0x18] sm:$0xff] }
  0x71   :  { %2440 = vmatprep.subr.mxu1 %v2980_v0  ;;  %2448 = vmatprep.mubr.msk.f32.mxu1 %vm2981_vm0, %v2980_v0  ;;  %v164_v3 = vld [vmem:[#allocation7 + $0x30] sm:$0xff]  ;;  %v3100_v4 = vld [vmem:[%s3485_s3 + $0x10] sm:$0xff]  ;;  %v3106_v6 = vld [vmem:[%s3485_s3 + $0x8] sm:$0xff]  ;;  %vm288_vm1 = vcmask 261120   ;;  %vm173_vm2 = vcmask 523264   ;;  %vm271_vm3 = vcmask 785408  }
  0x72   :  { %2418 = vmatprep.subr.mxu0 %v165_v1  ;;  %2441 = vmatpush3.msra.mxu1 %v3094_v2  ;;  %v163_v5 = vld [vmem:[#allocation7 + $0x28] sm:$0xff]  ;;  %v162_v7 = vld [vmem:[#allocation7 + $0x20] sm:$0xff]  ;;  %v3113_v8 = vld [vmem:[%s3485_s3] sm:$0xff]  ;;  %s2982_s21 = smov 32   ;;  %vm403_vm4 = vcmask 257024   ;;  %s2983_s1 = smov 96  }
  0x73   :  { %2419 = vmatpush3.msra.mxu0 %v165_v1  ;;  %2442 = vmatprep.subr.mxu1 %v2980_v0  ;;  %v3116_v9 = vld [vmem:[#allocation4] sm:$0xf]  ;;  %v2272_v12 = vld [vmem:[#allocation10] ss:$0 sm:$0xff]  ;;  %v160_v13 = vld [vmem:[#allocation7 + $0x10] sm:$0xff]  ;;  %s2984_s24 = smov [#allocation19]  }
  0x74   :  { %2420 = vmatprep.subr.mxu0 %v164_v3  ;;  %2443 = vmatpush3.msra.mxu1 %v3100_v4  ;;  %v161_v10 = vld [vmem:[#allocation7 + $0x18] sm:$0xff]  ;;  %v159_v14 = vld [vmem:[#allocation7 + $0x8] sm:$0xff]  ;;  %v158_v15 = vld [vmem:[#allocation7] sm:$0xff]  ;;  %s2254_s25 = sshll.u32 %s2984_s24, 4  ;;  %vm2246_vm5 = vcmask 76800   ;;  %s2255_s25 = int_to_ptr.vmem [resolvable:$true] %s2254_s25 }
  0x75   :  { %2421 = vmatpush3.msra.mxu0 %v164_v3  ;;  %2444 = vmatprep.subr.mxu1 %v2980_v0  ;;  %v154_v11 = vld [vmem:[%s3482_s0] sm:$0xff]  ;;  %v155_v16 = vld [vmem:[%s3482_s0 + $0x8] sm:$0xff]  ;;  %v156_v59 = vld [vmem:[%s3482_s0 + $0x10] sm:$0xff]  ;;  %p2940_p4 = scmp.lt.s32.totalorder %s2255_s25, %s2255_s25 }
  0x76   :  { %2422 = vmatprep.subr.mxu0 %v163_v5  ;;  %2445 = vmatpush3.msra.mxu1 %v3106_v6  ;;  %v3155_v22 = vld [vmem:[#allocation9] ss:$0 sm:$0xff]  ;;  %v157_v60 = vld [vmem:[%s3482_s0 + $0x18] sm:$0xff] }
  0x77   :  { %2423 = vmatpush3.msra.mxu0 %v163_v5  ;;  %2446 = vmatprep.subr.mxu1 %v2980_v0 }
  0x78   :  { %2424 = vmatprep.subr.mxu0 %v162_v7  ;;  %2447 = vmatpush3.msra.mxu1 %v3113_v8 }
  0x79   :  { %2425 = vmatpush3.msra.mxu0 %v162_v7  ;;  %2449 = vmatmul.mubr.msk.f32.vlgmr.msra.gmra.mxu1 %vm288_vm1, %v3116_v9 }
  0x7a   :  { %2426 = vmatprep.subr.mxu0 %v161_v10  ;;  %2434 = vmatprep.mubr.msk.f32.mxu0 %vm173_vm2, %v154_v11 }
  0x7b   :  { %2427 = vmatpush3.msra.mxu0 %v161_v10  ;;  %369 = vrot.lane.b32.xlu0 %v2272_v12, %s2974_s7 }
  0x7c   :  { %2428 = vmatprep.subr.mxu0 %v160_v13  ;;  %2451 = vmatprep.subr.mxu1 %v2980_v0 }
  0x7d   :  { %2429 = vmatpush3.msra.mxu0 %v160_v13  ;;  %2452 = vmatpush3.msra.mxu1 %v3094_v2 }
  0x7e   :  { %2430 = vmatprep.subr.mxu0 %v159_v14  ;;  %2453 = vmatprep.subr.mxu1 %v2980_v0 }
  0x7f   :  { %2431 = vmatpush3.msra.mxu0 %v159_v14  ;;  %2454 = vmatpush3.msra.mxu1 %v3100_v4 }
  0x80   :  { %2432 = vmatprep.subr.mxu0 %v158_v15  ;;  %2455 = vmatprep.subr.mxu1 %v2980_v0 }
  0x81   :  { %2433 = vmatpush3.msra.mxu0 %v158_v15  ;;  %2456 = vmatpush3.msra.mxu1 %v3106_v6 }
  0x82   :  { %2435 = vmatmul.mubr.msk.f32.vlgmr.msra.gmra.mxu0 %vm173_vm2, %v155_v16  ;;  %2457 = vmatprep.subr.mxu1 %v2980_v0 }
  0x83   :  { %2458 = vmatpush3.msra.mxu1 %v3113_v8  ;;  %2459 = vmatprep.mubr.msk.f32.mxu1 %vm2981_vm0, %v2980_v0 }
  0x84   :  { %2462 = vmatprep.subr.mxu0 %v2980_v0  ;;  %2473 = vmatprep.subr.mxu1 %v2980_v0 }
  0x85   :  { %2463 = vmatpush3.msra.mxu0 %v3094_v2  ;;  %2437 = vmatprep.mubr.msk.f32.mxu0 %vm173_vm2, %v156_v59 }
  0x86   :  { %2464 = vmatprep.subr.mxu0 %v2980_v0  ;;  %2438 = vmatmul.mubr.msk.f32.gmra.mxu0 %vm173_vm2, %v157_v60 }
  0x87   :  { %2465 = vmatpush3.msra.mxu0 %v3100_v4  ;;  %2470 = vmatprep.mubr.msk.f32.mxu0 %vm2981_vm0, %v2980_v0 }
  0x88   :  { %2466 = vmatprep.subr.mxu0 %v2980_v0 }
  0x89   :  { %2467 = vmatpush3.msra.mxu0 %v3106_v6 }
  0x8a   :  { %2468 = vmatprep.subr.mxu0 %v2980_v0 }
  0x8b   :  { %2469 = vmatpush3.msra.mxu0 %v3113_v8 }
  0x8c   :  { %2484 = vmatprep.subr.mxu0 %v2980_v0 }
  0xed   :  { %v3151_v17 = vpop.permute.xlu0 %369 }
 0x139   :  { %v358_v18 = vpop.f32.mrf.mxu1 }
 0x13a   :  { %v372_v19 = vadd.f32 %v3151_v17, %v358_v18 }
 0x13b   :  { %v2450_v20 = vpop.f32.mrf.mxu1 }
 0x13c   :  { %374 = vrot.lane.b32.xlu0 %v372_v19, %s2974_s7 }
 0x142   :  { %v2436_v21 = vpop.f32.mrf.mxu0 }
 0x143   :  { %v258_v23 = vadd.f32 %v2436_v21, %v3155_v22 }
 0x144   :  { %v252_v24 = vpop.f32.mrf.mxu0 }
 0x145   :  { %273 = vst.msk [vmem:[#allocation2 + $0x8] sm:$0xff] %vm271_vm3, %v258_v23  ;;  %v253_v25 = vadd.f32 %v3155_v22, %v252_v24 }
 0x146   :  { %v2439_v3 = vpop.f32.mrf.mxu0 }
 0x147   :  { %272 = vst.msk [vmem:[#allocation2] sm:$0xff] %vm271_vm3, %v253_v25  ;;  %v268_v5 = vadd.f32 %v2439_v3, %v3155_v22 }
 0x148   :  { %v262_v7 = vpop.f32.mrf.mxu0 }
 0x149   :  { %275 = vst.msk [vmem:[#allocation2 + $0x18] sm:$0xff] %vm271_vm3, %v268_v5 }
 0x14c   :  { %v513_v14 = vld [vmem:[#allocation2 + $0x8] sm:$0xf] }
 0x14e   :  { %v287_v26 = vld [vmem:[#allocation2] sm:$0xf]  ;;  %v405_v47 = vld [vmem:[#allocation2 + $0x4] sm:$0xf] }
 0x14f   :  { %v362_v27 = vadd.f32 %v358_v18, %v287_v26 }
 0x151   :  { %v2274_v28 = vmul.f32 -1.442695, %v362_v27 }
 0x153   :  { %2659 = vpow2.f32 %v2274_v28 }
 0x160   :  { %v2660_v29 = vpop.eup %2659 }
 0x161   :  { %v366_v30 = vadd.f32 1.0, %v2660_v29 }
 0x163   :  { %2661 = vrcp.f32 %v366_v30 }
 0x170   :  { %v2662_v31 = vpop.eup %2661 }
 0x1ae   :  { %v375_v32 = vpop.permute.xlu0 %374 }
 0x1af   :  { %v377_v33 = vmul.f32 %v2662_v31, %v375_v32 }
 0x1b1   :  { %379 = vrot.lane.b32.xlu1 %v377_v33, %s2974_s7 }
 0x223   :  { %v380_v34 = vpop.permute.xlu1 %379 }
 0x224   :  { %v382_v35 = vadd.f32 %v380_v34, %v287_v26 }
 0x226   :  { %2663 = vtanh.f32 %v382_v35  ;;  %v621_v35 = vld [vmem:[#allocation2 + $0xc] sm:$0xf] }
 0x233   :  { %v2664_v36 = vpop.eup %2663 }
 0x234   :  { %385 = vrot.lane.b32.xlu1 %v2664_v36, %s2974_s7 }
 0x2a6   :  { %v386_v37 = vpop.permute.xlu1 %385 }
 0x2a7   :  { %v388_v38 = vsub.f32 %v3116_v9, %v386_v37  ;;  %v263_v9 = vadd.f32 %v3155_v22, %v262_v7 }
 0x2a9   :  { %390 = vrot.lane.b32.xlu0 %v388_v38, %s2982_s21  ;;  %274 = vst.msk [vmem:[#allocation2 + $0x10] sm:$0xff] %vm271_vm3, %v263_v9 }
 0x31b   :  { %v391_v39 = vpop.permute.xlu0 %390 }
 0x31c   :  { %v393_v40 = vmul.f32 %v2662_v31, %v391_v39 }
 0x31e   :  { %395 = vrot.lane.b32.xlu1 %v393_v40, %s2982_s21 }
 0x390   :  { %v396_v41 = vpop.permute.xlu1 %395 }
 0x391   :  { %v398_v42 = vadd.f32 %v2664_v36, %v396_v41 }
 0x393   :  { %400 = vrot.lane.b32.xlu0 %v398_v42, %s2974_s7 }
 0x405   :  { %v401_v43 = vpop.permute.xlu0 %400 }
 0x406   :  { %404 = vst.msk [vmem:[#allocation3] sm:$0xf] %vm403_vm4, %v401_v43  ;;  %2460 = vmatmul.mubr.msk.f32.vlgmr.msra.gmra.mxu1 %vm288_vm1, %v401_v43 }
 0x407   :  { %2474 = vmatpush3.msra.mxu1 %v3094_v2  ;;  %2481 = vmatprep.mubr.msk.f32.mxu1 %vm2981_vm0, %v2980_v0 }
 0x408   :  { %2475 = vmatprep.subr.mxu1 %v2980_v0 }
 0x409   :  { %2476 = vmatpush3.msra.mxu1 %v3100_v4 }
 0x40a   :  { %2477 = vmatprep.subr.mxu1 %v2980_v0 }
 0x40b   :  { %2478 = vmatpush3.msra.mxu1 %v3106_v6 }
 0x40c   :  { %2479 = vmatprep.subr.mxu1 %v2980_v0 }
 0x40d   :  { %2480 = vmatpush3.msra.mxu1 %v3113_v8 }
 0x40e   :  { %2495 = vmatprep.subr.mxu1 %v2980_v0 }
 0x4c6   :  { %v474_v44 = vpop.f32.mrf.mxu1 }
 0x4c7   :  { %v485_v45 = vadd.f32 %v474_v44, %v3151_v17  ;;  %v478_v48 = vadd.f32 %v474_v44, %v405_v47 }
 0x4c8   :  { %v2461_v46 = vpop.f32.mrf.mxu1 }
 0x4c9   :  { %487 = vrot.lane.b32.xlu1 %v485_v45, %s2974_s7  ;;  %v2276_v49 = vmul.f32 -1.442695, %v478_v48 }
 0x4cb   :  { %2665 = vpow2.f32 %v2276_v49 }
 0x4d8   :  { %v2666_v50 = vpop.eup %2665 }
 0x4d9   :  { %v482_v51 = vadd.f32 1.0, %v2666_v50 }
 0x4db   :  { %2667 = vrcp.f32 %v482_v51 }
 0x4e8   :  { %v2668_v52 = vpop.eup %2667 }
 0x53b   :  { %v488_v53 = vpop.permute.xlu1 %487 }
 0x53c   :  { %v490_v54 = vmul.f32 %v2668_v52, %v488_v53 }
 0x53e   :  { %492 = vrot.lane.b32.xlu0 %v490_v54, %s2974_s7 }
 0x5b0   :  { %v493_v55 = vpop.permute.xlu0 %492 }
 0x5b1   :  { %v495_v56 = vadd.f32 %v493_v55, %v405_v47  ;;  %v729_v55 = vld [vmem:[#allocation2 + $0x10] sm:$0xf] }
 0x5b3   :  { %2669 = vtanh.f32 %v495_v56 }
 0x5c0   :  { %v2670_v57 = vpop.eup %2669 }
 0x5c1   :  { %v497_v58 = vsub.f32 %v398_v42, %v2670_v57 }
 0x5c3   :  { %499 = vrot.lane.b32.xlu1 %v497_v58, %s2983_s1 }
 0x635   :  { %v500_v61 = vpop.permute.xlu1 %499 }
 0x636   :  { %v502_v62 = vmul.f32 %v2668_v52, %v500_v61 }
 0x638   :  { %504 = vrot.lane.b32.xlu0 %v502_v62, %s2982_s21 }
 0x6aa   :  { %v505_v63 = vpop.permute.xlu0 %504 }
 0x6ab   :  { %v507_v1 = vadd.f32 %v2670_v57, %v505_v63 }
 0x6ad   :  { %509 = vrot.lane.b32.xlu1 %v507_v1, %s2974_s7 }
 0x71f   :  { %v510_v10 = vpop.permute.xlu1 %509 }
 0x720   :  { %512 = vst.msk [vmem:[#allocation3 + $0x4] sm:$0xf] %vm403_vm4, %v510_v10  ;;  %2471 = vmatmul.mubr.msk.f32.vlgmr.msra.gmra.mxu0 %vm288_vm1, %v510_v10 }
 0x721   :  { %2485 = vmatpush3.msra.mxu0 %v3094_v2  ;;  %2492 = vmatprep.mubr.msk.f32.mxu0 %vm2981_vm0, %v2980_v0 }
 0x722   :  { %2486 = vmatprep.subr.mxu0 %v2980_v0 }
 0x723   :  { %2487 = vmatpush3.msra.mxu0 %v3100_v4 }
 0x724   :  { %2488 = vmatprep.subr.mxu0 %v2980_v0 }
 0x725   :  { %2489 = vmatpush3.msra.mxu0 %v3106_v6 }
 0x726   :  { %2490 = vmatprep.subr.mxu0 %v2980_v0 }
 0x727   :  { %2491 = vmatpush3.msra.mxu0 %v3113_v8 }
 0x728   :  { %2506 = vmatprep.subr.mxu0 %v2980_v0 }
 0x7e0   :  { %v582_v11 = vpop.f32.mrf.mxu0 }
 0x7e1   :  { %v593_v12 = vadd.f32 %v582_v11, %v3151_v17  ;;  %v586_v15 = vadd.f32 %v582_v11, %v513_v14 }
 0x7e2   :  { %v2472_v13 = vpop.f32.mrf.mxu0 }
 0x7e3   :  { %595 = vrot.lane.b32.xlu0 %v593_v12, %s2974_s7  ;;  %v2278_v16 = vmul.f32 -1.442695, %v586_v15  ;;  %v837_v15 = vld [vmem:[#allocation2 + $0x14] sm:$0xf] }
 0x7e5   :  { %2671 = vpow2.f32 %v2278_v16 }
 0x7f2   :  { %v2672_v18 = vpop.eup %2671 }
 0x7f3   :  { %v590_v19 = vadd.f32 1.0, %v2672_v18 }
 0x7f5   :  { %2673 = vrcp.f32 %v590_v19 }
 0x802   :  { %v2674_v20 = vpop.eup %2673 }
 0x855   :  { %v596_v21 = vpop.permute.xlu0 %595 }
 0x856   :  { %v598_v22 = vmul.f32 %v2674_v20, %v596_v21 }
 0x858   :  { %600 = vrot.lane.b32.xlu1 %v598_v22, %s2974_s7 }
 0x8ca   :  { %v601_v23 = vpop.permute.xlu1 %600 }
 0x8cb   :  { %v603_v24 = vadd.f32 %v601_v23, %v513_v14 }
 0x8cd   :  { %2675 = vtanh.f32 %v603_v24 }
 0x8da   :  { %v2676_v25 = vpop.eup %2675 }
 0x8db   :  { %v605_v26 = vsub.f32 %v507_v1, %v2676_v25 }
 0x8dd   :  { %607 = vrot.lane.b32.xlu0 %v605_v26, %s2983_s1 }
 0x94f   :  { %v608_v27 = vpop.permute.xlu0 %607 }
 0x950   :  { %v610_v28 = vmul.f32 %v2674_v20, %v608_v27 }
 0x952   :  { %612 = vrot.lane.b32.xlu1 %v610_v28, %s2982_s21 }
 0x9c4   :  { %v613_v29 = vpop.permute.xlu1 %612 }
 0x9c5   :  { %v615_v30 = vadd.f32 %v2676_v25, %v613_v29  ;;  %v1168_v25 = vld [vmem:[#allocation12 + $0x18] sm:$0xff] }
 0x9c7   :  { %617 = vrot.lane.b32.xlu0 %v615_v30, %s2974_s7 }
 0xa39   :  { %v618_v31 = vpop.permute.xlu0 %617 }
 0xa3a   :  { %620 = vst.msk [vmem:[#allocation3 + $0x8] sm:$0xf] %vm403_vm4, %v618_v31  ;;  %2482 = vmatmul.mubr.msk.f32.vlgmr.msra.gmra.mxu1 %vm288_vm1, %v618_v31  ;;  %v1167_v31 = vld [vmem:[#allocation12 + $0x10] sm:$0xff] }
 0xa3b   :  { %2496 = vmatpush3.msra.mxu1 %v3094_v2  ;;  %2503 = vmatprep.mubr.msk.f32.mxu1 %vm2981_vm0, %v2980_v0 }
 0xa3c   :  { %2497 = vmatprep.subr.mxu1 %v2980_v0 }
 0xa3d   :  { %2498 = vmatpush3.msra.mxu1 %v3100_v4 }
 0xa3e   :  { %2499 = vmatprep.subr.mxu1 %v2980_v0 }
 0xa3f   :  { %2500 = vmatpush3.msra.mxu1 %v3106_v6 }
 0xa40   :  { %2501 = vmatprep.subr.mxu1 %v2980_v0 }
 0xa41   :  { %2502 = vmatpush3.msra.mxu1 %v3113_v8 }
 0xa42   :  { %2517 = vmatprep.subr.mxu1 %v2980_v0 }
 0xafa   :  { %v690_v32 = vpop.f32.mrf.mxu1 }
 0xafb   :  { %v701_v33 = vadd.f32 %v690_v32, %v3151_v17  ;;  %v694_v36 = vadd.f32 %v690_v32, %v621_v35  ;;  %v1161_v32 = vld [vmem:[#allocation3] sm:$0xff] }
 0xafc   :  { %v2483_v34 = vpop.f32.mrf.mxu1 }
 0xafd   :  { %703 = vrot.lane.b32.xlu1 %v701_v33, %s2974_s7  ;;  %v2280_v37 = vmul.f32 -1.442695, %v694_v36  ;;  %v1166_v33 = vld [vmem:[#allocation12 + $0x8] sm:$0xff]  ;;  %v1165_v34 = vld [vmem:[#allocation12] sm:$0xff] }
 0xaff   :  { %2677 = vpow2.f32 %v2280_v37 }
 0xb0c   :  { %v2678_v38 = vpop.eup %2677 }
 0xb0d   :  { %v698_v39 = vadd.f32 1.0, %v2678_v38 }
 0xb0f   :  { %2679 = vrcp.f32 %v698_v39 }
 0xb1c   :  { %v2680_v40 = vpop.eup %2679 }
 0xb6f   :  { %v704_v41 = vpop.permute.xlu1 %703 }
 0xb70   :  { %v706_v42 = vmul.f32 %v2680_v40, %v704_v41 }
 0xb72   :  { %708 = vrot.lane.b32.xlu0 %v706_v42, %s2974_s7 }
 0xbe4   :  { %v709_v43 = vpop.permute.xlu0 %708 }
 0xbe5   :  { %v711_v44 = vadd.f32 %v709_v43, %v621_v35 }
 0xbe7   :  { %2681 = vtanh.f32 %v711_v44 }
 0xbf4   :  { %v2682_v45 = vpop.eup %2681 }
 0xbf5   :  { %v713_v46 = vsub.f32 %v615_v30, %v2682_v45 }
 0xbf7   :  { %715 = vrot.lane.b32.xlu1 %v713_v46, %s2983_s1 }
 0xc69   :  { %v716_v47 = vpop.permute.xlu1 %715 }
 0xc6a   :  { %v718_v48 = vmul.f32 %v2680_v40, %v716_v47  ;;  %v3278_v40 = vld [vmem:[#allocation15] ss:$0 sm:$0xff] }
 0xc6c   :  { %720 = vrot.lane.b32.xlu0 %v718_v48, %s2982_s21 }
 0xcde   :  { %v721_v49 = vpop.permute.xlu0 %720 }
 0xcdf   :  { %v723_v50 = vadd.f32 %v2682_v45, %v721_v49  ;;  %v945_v45 = vld [vmem:[#allocation2 + $0x18] sm:$0xf] }
 0xce1   :  { %725 = vrot.lane.b32.xlu1 %v723_v50, %s2974_s7 }
 0xd53   :  { %v726_v51 = vpop.permute.xlu1 %725 }
 0xd54   :  { %728 = vst.msk [vmem:[#allocation3 + $0xc] sm:$0xf] %vm403_vm4, %v726_v51  ;;  %2493 = vmatmul.mubr.msk.f32.vlgmr.msra.gmra.mxu0 %vm288_vm1, %v726_v51 }
 0xd55   :  { %2507 = vmatpush3.msra.mxu0 %v3094_v2  ;;  %2514 = vmatprep.mubr.msk.f32.mxu0 %vm2981_vm0, %v2980_v0 }
 0xd56   :  { %2508 = vmatprep.subr.mxu0 %v2980_v0 }
 0xd57   :  { %2509 = vmatpush3.msra.mxu0 %v3100_v4 }
 0xd58   :  { %2510 = vmatprep.subr.mxu0 %v2980_v0 }
 0xd59   :  { %2511 = vmatpush3.msra.mxu0 %v3106_v6 }
 0xd5a   :  { %2512 = vmatprep.subr.mxu0 %v2980_v0 }
 0xd5b   :  { %2513 = vmatpush3.msra.mxu0 %v3113_v8  ;;  %v1162_v35 = vld [vmem:[#allocation3 + $0x8] sm:$0xff] }
 0xd5c   :  { %2528 = vmatprep.subr.mxu0 %v1168_v25 }
 0xe14   :  { %v798_v52 = vpop.f32.mrf.mxu0 }
 0xe15   :  { %v809_v53 = vadd.f32 %v798_v52, %v3151_v17  ;;  %v802_v56 = vadd.f32 %v798_v52, %v729_v55 }
 0xe16   :  { %v2494_v54 = vpop.f32.mrf.mxu0 }
 0xe17   :  { %811 = vrot.lane.b32.xlu0 %v809_v53, %s2974_s7  ;;  %v2282_v57 = vmul.f32 -1.442695, %v802_v56 }
 0xe19   :  { %2683 = vpow2.f32 %v2282_v57 }
 0xe26   :  { %v2684_v58 = vpop.eup %2683 }
 0xe27   :  { %v806_v59 = vadd.f32 1.0, %v2684_v58 }
 0xe29   :  { %2685 = vrcp.f32 %v806_v59  ;;  %v3287_v59 = vld [vmem:[#allocation13 + $0x18] sm:$0xff] }
 0xe36   :  { %v2686_v60 = vpop.eup %2685 }
 0xe89   :  { %v812_v61 = vpop.permute.xlu0 %811 }
 0xe8a   :  { %v814_v62 = vmul.f32 %v2686_v60, %v812_v61  ;;  %v3294_v61 = vld [vmem:[#allocation13 + $0x8] sm:$0xff] }
 0xe8c   :  { %816 = vrot.lane.b32.xlu1 %v814_v62, %s2974_s7  ;;  %v3298_v62 = vld [vmem:[#allocation13] sm:$0xff] }
 0xefe   :  { %v817_v63 = vpop.permute.xlu1 %816 }
 0xeff   :  { %v819_v1 = vadd.f32 %v817_v63, %v729_v55  ;;  %v2294_v63 = vld [vmem:[#allocation16] ss:$0 sm:$0xff] }
 0xf01   :  { %2687 = vtanh.f32 %v819_v1 }
 0xf0e   :  { %v2688_v3 = vpop.eup %2687 }
 0xf0f   :  { %v821_v5 = vsub.f32 %v723_v50, %v2688_v3 }
 0xf11   :  { %823 = vrot.lane.b32.xlu0 %v821_v5, %s2983_s1 }
 0xf83   :  { %v824_v7 = vpop.permute.xlu0 %823 }
 0xf84   :  { %v826_v9 = vmul.f32 %v2686_v60, %v824_v7  ;;  %v3290_v60 = vld [vmem:[#allocation13 + $0x10] sm:$0xff]  ;;  %v1288_v7 = vld [vmem:[#allocation4 + $0x4] sm:$0xf] }
 0xf86   :  { %828 = vrot.lane.b32.xlu1 %v826_v9, %s2982_s21 }
 0xff8   :  { %v829_v10 = vpop.permute.xlu1 %828 }
 0xff9   :  { %v831_v11 = vadd.f32 %v2688_v3, %v829_v10 }
 0xffb   :  { %833 = vrot.lane.b32.xlu0 %v831_v11, %s2974_s7 }
0x106d   :  { %v834_v12 = vpop.permute.xlu0 %833 }
0x106e   :  { %836 = vst.msk [vmem:[#allocation3 + $0x10] sm:$0xf] %vm403_vm4, %v834_v12  ;;  %2504 = vmatmul.mubr.msk.f32.vlgmr.msra.gmra.mxu1 %vm288_vm1, %v834_v12 }
0x106f   :  { %2518 = vmatpush3.msra.mxu1 %v3094_v2  ;;  %2525 = vmatprep.mubr.msk.f32.mxu1 %vm2981_vm0, %v2980_v0 }
0x1070   :  { %2519 = vmatprep.subr.mxu1 %v2980_v0 }
0x1071   :  { %2520 = vmatpush3.msra.mxu1 %v3100_v4 }
0x1072   :  { %2521 = vmatprep.subr.mxu1 %v2980_v0 }
0x1073   :  { %2522 = vmatpush3.msra.mxu1 %v3106_v6 }
0x1074   :  { %2523 = vmatprep.subr.mxu1 %v2980_v0 }
0x1075   :  { %2524 = vmatpush3.msra.mxu1 %v3113_v8 }
0x1076   :  { %2542 = vmatprep.subr.mxu1 %v2980_v0 }
0x112e   :  { %v906_v13 = vpop.f32.mrf.mxu1 }
0x112f   :  { %v917_v2 = vadd.f32 %v906_v13, %v3151_v17  ;;  %v910_v16 = vadd.f32 %v906_v13, %v837_v15 }
0x1130   :  { %v2505_v14 = vpop.f32.mrf.mxu1 }
0x1131   :  { %919 = vrot.lane.b32.xlu1 %v917_v2, %s2974_s7  ;;  %v2284_v18 = vmul.f32 -1.442695, %v910_v16 }
0x1133   :  { %2689 = vpow2.f32 %v2284_v18 }
0x1140   :  { %v2690_v4 = vpop.eup %2689 }
0x1141   :  { %v914_v19 = vadd.f32 1.0, %v2690_v4 }
0x1143   :  { %2691 = vrcp.f32 %v914_v19 }
0x1150   :  { %v2692_v6 = vpop.eup %2691 }
0x11a3   :  { %v920_v20 = vpop.permute.xlu1 %919 }
0x11a4   :  { %v922_v21 = vmul.f32 %v2692_v6, %v920_v20 }
0x11a6   :  { %924 = vrot.lane.b32.xlu0 %v922_v21, %s2974_s7 }
0x1218   :  { %v925_v8 = vpop.permute.xlu0 %924 }
0x1219   :  { %v927_v22 = vadd.f32 %v925_v8, %v837_v15  ;;  %v1053_v15 = vld [vmem:[#allocation2 + $0x1c] sm:$0xf] }
0x121b   :  { %2693 = vtanh.f32 %v927_v22 }
0x1228   :  { %v2694_v23 = vpop.eup %2693 }
0x1229   :  { %v929_v24 = vsub.f32 %v831_v11, %v2694_v23 }
0x122b   :  { %931 = vrot.lane.b32.xlu1 %v929_v24, %s2983_s1 }
0x129d   :  { %v932_v26 = vpop.permute.xlu1 %931 }
0x129e   :  { %v934_v27 = vmul.f32 %v2692_v6, %v932_v26 }
0x12a0   :  { %936 = vrot.lane.b32.xlu0 %v934_v27, %s2982_s21 }
0x1312   :  { %v937_v28 = vpop.permute.xlu0 %936 }
0x1313   :  { %v939_v29 = vadd.f32 %v2694_v23, %v937_v28 }
0x1315   :  { %941 = vrot.lane.b32.xlu1 %v939_v29, %s2974_s7 }
0x1387   :  { %v942_v30 = vpop.permute.xlu1 %941 }
0x1388   :  { %944 = vst.msk [vmem:[#allocation3 + $0x14] sm:$0xf] %vm403_vm4, %v942_v30  ;;  %2515 = vmatmul.mubr.msk.f32.vlgmr.msra.gmra.mxu0 %vm288_vm1, %v942_v30 }
0x1389   :  { %2529 = vmatpush3.msra.mxu0 %v1168_v25  ;;  %2536 = vmatprep.mubr.msk.f32.mxu0 %vm288_vm1, %v1161_v32 }
0x138a   :  { %2530 = vmatprep.subr.mxu0 %v1167_v31 }
0x138b   :  { %2531 = vmatpush3.msra.mxu0 %v1167_v31 }
0x138c   :  { %2532 = vmatprep.subr.mxu0 %v1166_v33 }
0x138d   :  { %2533 = vmatpush3.msra.mxu0 %v1166_v33 }
0x138e   :  { %2534 = vmatprep.subr.mxu0 %v1165_v34 }
0x138f   :  { %2535 = vmatpush3.msra.mxu0 %v1165_v34  ;;  %v1163_v36 = vld [vmem:[#allocation3 + $0x10] sm:$0xff] }
0x1390   :  { %2537 = vmatmul.mubr.msk.f32.vlgmr.msra.gmra.mxu0 %vm288_vm1, %v1162_v35  ;;  %2553 = vmatprep.subr.mxu0 %v2980_v0 }
0x1391   :  { %2539 = vmatprep.mubr.msk.f32.mxu0 %vm288_vm1, %v1163_v36  ;;  %2554 = vmatpush3.msra.mxu0 %v3287_v59 }
0x1392   :  { %2555 = vmatprep.subr.mxu0 %v2980_v0 }
0x1393   :  { %2556 = vmatpush3.msra.mxu0 %v3290_v60 }
0x1394   :  { %2557 = vmatprep.subr.mxu0 %v2980_v0 }
0x1395   :  { %2558 = vmatpush3.msra.mxu0 %v3294_v61 }
0x1396   :  { %2559 = vmatprep.subr.mxu0 %v2980_v0 }
0x1397   :  { %2560 = vmatpush3.msra.mxu0 %v3298_v62 }
0x1398   :  { %2575 = vmatprep.subr.mxu0 %v2980_v0 }
0x1448   :  { %v1014_v37 = vpop.f32.mrf.mxu0 }
0x1449   :  { %v1025_v38 = vadd.f32 %v1014_v37, %v3151_v17  ;;  %v1018_v46 = vadd.f32 %v1014_v37, %v945_v45 }
0x144a   :  { %v2516_v39 = vpop.f32.mrf.mxu0 }
0x144b   :  { %1027 = vrot.lane.b32.xlu0 %v1025_v38, %s2974_s7  ;;  %v2286_v47 = vmul.f32 -1.442695, %v1018_v46 }
0x144d   :  { %2695 = vpow2.f32 %v2286_v47 }
0x1450   :  { %v2538_v41 = vpop.f32.mrf.mxu0 }
0x1451   :  { %v1260_v42 = vadd.f32 %v2538_v41, %v3278_v40 }
0x1452   :  { %v1254_v43 = vpop.f32.mrf.mxu0 }
0x1453   :  { %1274 = vst.msk [vmem:[#allocation2 + $0x8] sm:$0xff] %vm271_vm3, %v1260_v42  ;;  %v1255_v44 = vadd.f32 %v3278_v40, %v1254_v43 }
0x1455   :  { %1273 = vst.msk [vmem:[#allocation2] sm:$0xff] %vm271_vm3, %v1255_v44 }
0x145a   :  { %v2696_v48 = vpop.eup %2695 }
0x145b   :  { %v1022_v49 = vadd.f32 1.0, %v2696_v48 }
0x145c   :  { %v1289_v4 = vld [vmem:[#allocation2] sm:$0xf] }
0x145d   :  { %2697 = vrcp.f32 %v1022_v49 }
0x146a   :  { %v2698_v50 = vpop.eup %2697 }
0x14bd   :  { %v1028_v51 = vpop.permute.xlu0 %1027 }
0x14be   :  { %v1030_v52 = vmul.f32 %v2698_v50, %v1028_v51 }
0x14c0   :  { %1032 = vrot.lane.b32.xlu1 %v1030_v52, %s2974_s7 }
0x1532   :  { %v1033_v53 = vpop.permute.xlu1 %1032 }
0x1533   :  { %v1035_v54 = vadd.f32 %v1033_v53, %v945_v45 }
0x1535   :  { %2699 = vtanh.f32 %v1035_v54 }
0x1542   :  { %v2700_v55 = vpop.eup %2699 }
0x1543   :  { %v1037_v56 = vsub.f32 %v939_v29, %v2700_v55 }
0x1545   :  { %1039 = vrot.lane.b32.xlu0 %v1037_v56, %s2983_s1  ;;  %v1405_v56 = vld [vmem:[#allocation2 + $0x4] sm:$0xf] }
0x15b7   :  { %v1040_v57 = vpop.permute.xlu0 %1039 }
0x15b8   :  { %v1042_v58 = vmul.f32 %v2698_v50, %v1040_v57 }
0x15ba   :  { %1044 = vrot.lane.b32.xlu1 %v1042_v58, %s2982_s21 }
0x15be   :  { %1370 = vrot.lane.b32.xlu1 %v2294_v63, %s2974_s7 }
0x162c   :  { %v1045_v1 = vpop.permute.xlu1 %1044 }
0x162d   :  { %v3304_v3 = vadd.f32 %v2700_v55, %v1045_v1 }
0x162f   :  { %1049 = vrot.lane.b32.xlu0 %v3304_v3, %s2974_s7 }
0x1630   :  { %v3333_v12 = vpop.permute.xlu1 %1370 }
0x16a1   :  { %v1050_v5 = vpop.permute.xlu0 %1049 }
0x16a2   :  { %1052 = vst.msk [vmem:[#allocation3 + $0x18] sm:$0xf] %vm403_vm4, %v1050_v5  ;;  %2526 = vmatmul.mubr.msk.f32.vlgmr.msra.gmra.mxu1 %vm288_vm1, %v1050_v5 }
0x16a3   :  { %2543 = vmatpush3.msra.mxu1 %v3287_v59  ;;  %2550 = vmatprep.mubr.msk.f32.mxu1 %vm2981_vm0, %v2980_v0 }
0x16a4   :  { %2544 = vmatprep.subr.mxu1 %v2980_v0 }
0x16a5   :  { %2545 = vmatpush3.msra.mxu1 %v3290_v60 }
0x16a6   :  { %2546 = vmatprep.subr.mxu1 %v2980_v0 }
0x16a7   :  { %2547 = vmatpush3.msra.mxu1 %v3294_v61 }
0x16a8   :  { %2548 = vmatprep.subr.mxu1 %v2980_v0 }
0x16a9   :  { %2549 = vmatpush3.msra.mxu1 %v3298_v62 }
0x16aa   :  { %2551 = vmatmul.mubr.msk.f32.vlgmr.msra.gmra.mxu1 %vm288_vm1, %v1288_v7  ;;  %2564 = vmatprep.subr.mxu1 %v2980_v0 }
0x16ab   :  { %2565 = vmatpush3.msra.mxu1 %v3287_v59  ;;  %2572 = vmatprep.mubr.msk.f32.mxu1 %vm2981_vm0, %v2980_v0 }
0x16ac   :  { %2566 = vmatprep.subr.mxu1 %v2980_v0 }
0x16ad   :  { %2567 = vmatpush3.msra.mxu1 %v3290_v60 }
0x16ae   :  { %2568 = vmatprep.subr.mxu1 %v2980_v0 }
0x16af   :  { %2569 = vmatpush3.msra.mxu1 %v3294_v61 }
0x16b0   :  { %2570 = vmatprep.subr.mxu1 %v2980_v0 }
0x16b1   :  { %2571 = vmatpush3.msra.mxu1 %v3298_v62 }
0x16b2   :  { %2586 = vmatprep.subr.mxu1 %v2980_v0 }
0x1762   :  { %v1122_v9 = vpop.f32.mrf.mxu1 }
0x1763   :  { %v1133_v10 = vadd.f32 %v1122_v9, %v3151_v17  ;;  %v1126_v16 = vadd.f32 %v1122_v9, %v1053_v15 }
0x1764   :  { %v2527_v11 = vpop.f32.mrf.mxu1 }
0x1765   :  { %1135 = vrot.lane.b32.xlu1 %v1133_v10, %s2974_s7  ;;  %v2288_v18 = vmul.f32 -1.442695, %v1126_v16 }
0x1767   :  { %2701 = vpow2.f32 %v2288_v18 }
0x176a   :  { %v1359_v13 = vpop.f32.mrf.mxu1 }
0x176b   :  { %v1373_v2 = vadd.f32 %v3333_v12, %v1359_v13  ;;  %v1363_v19 = vadd.f32 %v1359_v13, %v1289_v4 }
0x176c   :  { %v2552_v14 = vpop.f32.mrf.mxu1 }
0x176d   :  { %1375 = vrot.lane.b32.xlu0 %v1373_v2, %s2974_s7  ;;  %v2296_v6 = vmul.f32 -1.442695, %v1363_v19 }
0x176f   :  { %2703 = vpow2.f32 %v2296_v6  ;;  %v1513_v6 = vld [vmem:[#allocation2 + $0x8] sm:$0xf] }
0x1774   :  { %v2702_v17 = vpop.eup %2701 }
0x1775   :  { %v1130_v20 = vadd.f32 1.0, %v2702_v17 }
0x1777   :  { %2705 = vrcp.f32 %v1130_v20 }
0x177c   :  { %v2704_v21 = vpop.eup %2703 }
0x177d   :  { %v1367_v8 = vadd.f32 1.0, %v2704_v21 }
0x177f   :  { %2707 = vrcp.f32 %v1367_v8 }
0x1784   :  { %v2706_v22 = vpop.eup %2705 }
0x178c   :  { %v2708_v25 = vpop.eup %2707 }
0x17d7   :  { %v1136_v23 = vpop.permute.xlu1 %1135 }
0x17d8   :  { %v1138_v24 = vmul.f32 %v2706_v22, %v1136_v23 }
0x17da   :  { %1140 = vrot.lane.b32.xlu1 %v1138_v24, %s2974_s7 }
0x17df   :  { %v1376_v26 = vpop.permute.xlu0 %1375 }
0x17e0   :  { %v1378_v27 = vmul.f32 %v2708_v25, %v1376_v26 }
0x17e2   :  { %1380 = vrot.lane.b32.xlu0 %v1378_v27, %s2974_s7 }
0x184c   :  { %v1141_v28 = vpop.permute.xlu1 %1140 }
0x184d   :  { %v1143_v29 = vadd.f32 %v1141_v28, %v1053_v15 }
0x184f   :  { %2709 = vtanh.f32 %v1143_v29 }
0x1854   :  { %v1381_v30 = vpop.permute.xlu0 %1380 }
0x1855   :  { %v1383_v31 = vadd.f32 %v1381_v30, %v1289_v4 }
0x1857   :  { %2711 = vtanh.f32 %v1383_v31 }
0x185c   :  { %v2710_v32 = vpop.eup %2709 }
0x185d   :  { %v1145_v33 = vsub.f32 %v3304_v3, %v2710_v32 }
0x185f   :  { %1147 = vrot.lane.b32.xlu1 %v1145_v33, %s2983_s1 }
0x1864   :  { %v2712_v34 = vpop.eup %2711 }
0x1865   :  { %1386 = vrot.lane.b32.xlu0 %v2712_v34, %s2974_s7 }
0x18d1   :  { %v1148_v35 = vpop.permute.xlu1 %1147 }
0x18d2   :  { %v1150_v36 = vmul.f32 %v2706_v22, %v1148_v35 }
0x18d4   :  { %1152 = vrot.lane.b32.xlu1 %v1150_v36, %s2982_s21 }
0x18d7   :  { %v1387_v37 = vpop.permute.xlu0 %1386 }
0x18d8   :  { %v1389_v38 = vsub.f32 %v1288_v7, %v1387_v37  ;;  %v1621_v37 = vld [vmem:[#allocation2 + $0xc] sm:$0xf] }
0x18da   :  { %1391 = vrot.lane.b32.xlu0 %v1389_v38, %s2982_s21 }
0x1946   :  { %v1153_v39 = vpop.permute.xlu1 %1152 }
0x1947   :  { %v1155_v41 = vadd.f32 %v2710_v32, %v1153_v39 }
0x1949   :  { %1157 = vrot.lane.b32.xlu1 %v1155_v41, %s2974_s7 }
0x194c   :  { %v1392_v42 = vpop.permute.xlu0 %1391 }
0x194d   :  { %v1394_v43 = vmul.f32 %v2708_v25, %v1392_v42 }
0x194f   :  { %1396 = vrot.lane.b32.xlu0 %v1394_v43, %s2982_s21 }
0x19bb   :  { %v1158_v44 = vpop.permute.xlu1 %1157 }
0x19bc   :  { %1160 = vst.msk [vmem:[#allocation3 + $0x1c] sm:$0xf] %vm403_vm4, %v1158_v44 }
0x19c1   :  { %v1397_v45 = vpop.permute.xlu0 %1396 }
0x19c2   :  { %v1399_v46 = vadd.f32 %v2712_v34, %v1397_v45 }
0x19c3   :  { %v1164_v47 = vld [vmem:[#allocation3 + $0x18] sm:$0xff] }
0x19c4   :  { %1401 = vrot.lane.b32.xlu0 %v1399_v46, %s2974_s7  ;;  %2540 = vmatmul.mubr.msk.f32.gmra.mxu0 %vm288_vm1, %v1164_v47 }
0x19c5   :  { %2561 = vmatprep.mubr.msk.f32.mxu0 %vm2981_vm0, %v2980_v0 }
0x1a36   :  { %v1402_v48 = vpop.permute.xlu0 %1401 }
0x1a37   :  { %1404 = vst.msk [vmem:[#allocation3] sm:$0xf] %vm403_vm4, %v1402_v48  ;;  %2562 = vmatmul.mubr.msk.f32.vlgmr.msra.gmra.mxu0 %vm288_vm1, %v1402_v48 }
0x1a38   :  { %2576 = vmatpush3.msra.mxu0 %v3287_v59  ;;  %2583 = vmatprep.mubr.msk.f32.mxu0 %vm2981_vm0, %v2980_v0 }
0x1a39   :  { %2577 = vmatprep.subr.mxu0 %v2980_v0 }
0x1a3a   :  { %2578 = vmatpush3.msra.mxu0 %v3290_v60 }
0x1a3b   :  { %2579 = vmatprep.subr.mxu0 %v2980_v0 }
0x1a3c   :  { %2580 = vmatpush3.msra.mxu0 %v3294_v61 }
0x1a3d   :  { %2581 = vmatprep.subr.mxu0 %v2980_v0 }
0x1a3e   :  { %2582 = vmatpush3.msra.mxu0 %v3298_v62 }
0x1a3f   :  { %2597 = vmatprep.subr.mxu0 %v2980_v0 }
0x1a84   :  { %v2541_v49 = vpop.f32.mrf.mxu0 }
0x1a85   :  { %v1270_v50 = vadd.f32 %v2541_v49, %v3278_v40 }
0x1a86   :  { %v1264_v51 = vpop.f32.mrf.mxu0 }
0x1a87   :  { %1276 = vst.msk [vmem:[#allocation2 + $0x18] sm:$0xff] %vm271_vm3, %v1270_v50  ;;  %v1265_v52 = vadd.f32 %v3278_v40, %v1264_v51 }
0x1a89   :  { %1275 = vst.msk [vmem:[#allocation2 + $0x10] sm:$0xff] %vm271_vm3, %v1265_v52 }
0x1af7   :  { %v1474_v53 = vpop.f32.mrf.mxu0 }
0x1af8   :  { %v1485_v54 = vadd.f32 %v1474_v53, %v3333_v12  ;;  %v1478_v57 = vadd.f32 %v1474_v53, %v1405_v56 }
0x1af9   :  { %v2563_v55 = vpop.f32.mrf.mxu0 }
0x1afa   :  { %1487 = vrot.lane.b32.xlu1 %v1485_v54, %s2974_s7  ;;  %v2298_v58 = vmul.f32 -1.442695, %v1478_v57 }
0x1afc   :  { %2713 = vpow2.f32 %v2298_v58  ;;  %v1729_v58 = vld [vmem:[#allocation2 + $0x10] sm:$0xf] }
0x1b09   :  { %v2714_v63 = vpop.eup %2713 }
0x1b0a   :  { %v1482_v1 = vadd.f32 1.0, %v2714_v63 }
0x1b0c   :  { %2715 = vrcp.f32 %v1482_v1 }
0x1b19   :  { %v2716_v3 = vpop.eup %2715 }
0x1b6c   :  { %v1488_v5 = vpop.permute.xlu1 %1487 }
0x1b6d   :  { %v1490_v7 = vmul.f32 %v2716_v3, %v1488_v5 }
0x1b6f   :  { %1492 = vrot.lane.b32.xlu0 %v1490_v7, %s2974_s7 }
0x1be1   :  { %v1493_v40 = vpop.permute.xlu0 %1492 }
0x1be2   :  { %v1495_v9 = vadd.f32 %v1493_v40, %v1405_v56 }
0x1be4   :  { %2717 = vtanh.f32 %v1495_v9 }
0x1bf1   :  { %v2718_v10 = vpop.eup %2717 }
0x1bf2   :  { %v1497_v11 = vsub.f32 %v1399_v46, %v2718_v10 }
0x1bf4   :  { %1499 = vrot.lane.b32.xlu1 %v1497_v11, %s2983_s1 }
0x1c66   :  { %v1500_v13 = vpop.permute.xlu1 %1499 }
0x1c67   :  { %v1502_v2 = vmul.f32 %v2716_v3, %v1500_v13 }
0x1c69   :  { %1504 = vrot.lane.b32.xlu0 %v1502_v2, %s2982_s21 }
0x1cdb   :  { %v1505_v14 = vpop.permute.xlu0 %1504 }
0x1cdc   :  { %v1507_v15 = vadd.f32 %v2718_v10, %v1505_v14 }
0x1cde   :  { %1509 = vrot.lane.b32.xlu1 %v1507_v15, %s2974_s7 }
0x1d50   :  { %v1510_v16 = vpop.permute.xlu1 %1509 }
0x1d51   :  { %1512 = vst.msk [vmem:[#allocation3 + $0x4] sm:$0xf] %vm403_vm4, %v1510_v16  ;;  %2573 = vmatmul.mubr.msk.f32.vlgmr.msra.gmra.mxu1 %vm288_vm1, %v1510_v16 }
0x1d52   :  { %2587 = vmatpush3.msra.mxu1 %v3287_v59  ;;  %2594 = vmatprep.mubr.msk.f32.mxu1 %vm2981_vm0, %v2980_v0 }
0x1d53   :  { %2588 = vmatprep.subr.mxu1 %v2980_v0 }
0x1d54   :  { %2589 = vmatpush3.msra.mxu1 %v3290_v60 }
0x1d55   :  { %2590 = vmatprep.subr.mxu1 %v2980_v0 }
0x1d56   :  { %2591 = vmatpush3.msra.mxu1 %v3294_v61 }
0x1d57   :  { %2592 = vmatprep.subr.mxu1 %v2980_v0 }
0x1d58   :  { %2593 = vmatpush3.msra.mxu1 %v3298_v62 }
0x1d59   :  { %2608 = vmatprep.subr.mxu1 %v2980_v0 }
0x1e11   :  { %v1582_v18 = vpop.f32.mrf.mxu1 }
0x1e12   :  { %v1593_v4 = vadd.f32 %v1582_v18, %v3333_v12  ;;  %v1586_v17 = vadd.f32 %v1582_v18, %v1513_v6 }
0x1e13   :  { %v2574_v19 = vpop.f32.mrf.mxu1 }
0x1e14   :  { %1595 = vrot.lane.b32.xlu0 %v1593_v4, %s2974_s7  ;;  %v2300_v20 = vmul.f32 -1.442695, %v1586_v17 }
0x1e16   :  { %2719 = vpow2.f32 %v2300_v20 }
0x1e23   :  { %v2720_v21 = vpop.eup %2719 }
0x1e24   :  { %v1590_v8 = vadd.f32 1.0, %v2720_v21 }
0x1e26   :  { %2721 = vrcp.f32 %v1590_v8 }
0x1e33   :  { %v2722_v22 = vpop.eup %2721 }
0x1e86   :  { %v1596_v23 = vpop.permute.xlu0 %1595 }
0x1e87   :  { %v1598_v24 = vmul.f32 %v2722_v22, %v1596_v23 }
0x1e89   :  { %1600 = vrot.lane.b32.xlu1 %v1598_v24, %s2974_s7 }
0x1efb   :  { %v1601_v25 = vpop.permute.xlu1 %1600 }
0x1efc   :  { %v1603_v26 = vadd.f32 %v1601_v25, %v1513_v6 }
0x1efe   :  { %2723 = vtanh.f32 %v1603_v26 }
0x1f0b   :  { %v2724_v27 = vpop.eup %2723 }
0x1f0c   :  { %v1605_v28 = vsub.f32 %v1507_v15, %v2724_v27 }
0x1f0e   :  { %1607 = vrot.lane.b32.xlu0 %v1605_v28, %s2983_s1 }
0x1f80   :  { %v1608_v29 = vpop.permute.xlu0 %1607 }
0x1f81   :  { %v1610_v30 = vmul.f32 %v2722_v22, %v1608_v29 }
0x1f83   :  { %1612 = vrot.lane.b32.xlu1 %v1610_v30, %s2982_s21 }
0x1ff5   :  { %v1613_v31 = vpop.permute.xlu1 %1612 }
0x1ff6   :  { %v1615_v32 = vadd.f32 %v2724_v27, %v1613_v31 }
0x1ff8   :  { %1617 = vrot.lane.b32.xlu0 %v1615_v32, %s2974_s7 }
0x206a   :  { %v1618_v33 = vpop.permute.xlu0 %1617 }
0x206b   :  { %1620 = vst.msk [vmem:[#allocation3 + $0x8] sm:$0xf] %vm403_vm4, %v1618_v33  ;;  %2584 = vmatmul.mubr.msk.f32.vlgmr.msra.gmra.mxu0 %vm288_vm1, %v1618_v33 }
0x206c   :  { %2598 = vmatpush3.msra.mxu0 %v3287_v59  ;;  %2605 = vmatprep.mubr.msk.f32.mxu0 %vm2981_vm0, %v2980_v0 }
0x206d   :  { %2599 = vmatprep.subr.mxu0 %v2980_v0 }
0x206e   :  { %2600 = vmatpush3.msra.mxu0 %v3290_v60 }
0x206f   :  { %2601 = vmatprep.subr.mxu0 %v2980_v0 }
0x2070   :  { %2602 = vmatpush3.msra.mxu0 %v3294_v61 }
0x2071   :  { %2603 = vmatprep.subr.mxu0 %v2980_v0 }
0x2072   :  { %2604 = vmatpush3.msra.mxu0 %v3298_v62 }
0x2073   :  { %2619 = vmatprep.subr.mxu0 %v2980_v0 }
0x212b   :  { %v1690_v34 = vpop.f32.mrf.mxu0 }
0x212c   :  { %v1701_v35 = vadd.f32 %v1690_v34, %v3333_v12  ;;  %v1694_v38 = vadd.f32 %v1690_v34, %v1621_v37 }
0x212d   :  { %v2585_v36 = vpop.f32.mrf.mxu0 }
0x212e   :  { %1703 = vrot.lane.b32.xlu1 %v1701_v35, %s2974_s7  ;;  %v2302_v39 = vmul.f32 -1.442695, %v1694_v38  ;;  %v1945_v35 = vld [vmem:[#allocation2 + $0x18] sm:$0xf] }
0x2130   :  { %2725 = vpow2.f32 %v2302_v39 }
0x213d   :  { %v2726_v41 = vpop.eup %2725 }
0x213e   :  { %v1698_v42 = vadd.f32 1.0, %v2726_v41 }
0x2140   :  { %2727 = vrcp.f32 %v1698_v42 }
0x214d   :  { %v2728_v43 = vpop.eup %2727 }
0x21a0   :  { %v1704_v44 = vpop.permute.xlu1 %1703 }
0x21a1   :  { %v1706_v45 = vmul.f32 %v2728_v43, %v1704_v44 }
0x21a3   :  { %1708 = vrot.lane.b32.xlu0 %v1706_v45, %s2974_s7 }
0x2215   :  { %v1709_v46 = vpop.permute.xlu0 %1708 }
0x2216   :  { %v1711_v47 = vadd.f32 %v1709_v46, %v1621_v37 }
0x2218   :  { %2729 = vtanh.f32 %v1711_v47 }
0x2225   :  { %v2730_v48 = vpop.eup %2729 }
0x2226   :  { %v1713_v49 = vsub.f32 %v1615_v32, %v2730_v48 }
0x2228   :  { %1715 = vrot.lane.b32.xlu1 %v1713_v49, %s2983_s1 }
0x229a   :  { %v1716_v50 = vpop.permute.xlu1 %1715 }
0x229b   :  { %v1718_v51 = vmul.f32 %v2728_v43, %v1716_v50 }
0x229d   :  { %1720 = vrot.lane.b32.xlu0 %v1718_v51, %s2982_s21 }
0x230f   :  { %v1721_v52 = vpop.permute.xlu0 %1720 }
0x2310   :  { %v1723_v53 = vadd.f32 %v2730_v48, %v1721_v52 }
0x2312   :  { %1725 = vrot.lane.b32.xlu1 %v1723_v53, %s2974_s7 }
0x2384   :  { %v1726_v54 = vpop.permute.xlu1 %1725 }
0x2385   :  { %1728 = vst.msk [vmem:[#allocation3 + $0xc] sm:$0xf] %vm403_vm4, %v1726_v54  ;;  %2595 = vmatmul.mubr.msk.f32.vlgmr.msra.gmra.mxu1 %vm288_vm1, %v1726_v54 }
0x2386   :  { %2609 = vmatpush3.msra.mxu1 %v3287_v59  ;;  %2616 = vmatprep.mubr.msk.f32.mxu1 %vm2981_vm0, %v2980_v0 }
0x2387   :  { %2610 = vmatprep.subr.mxu1 %v2980_v0 }
0x2388   :  { %2611 = vmatpush3.msra.mxu1 %v3290_v60 }
0x2389   :  { %2612 = vmatprep.subr.mxu1 %v2980_v0 }
0x238a   :  { %2613 = vmatpush3.msra.mxu1 %v3294_v61 }
0x238b   :  { %2614 = vmatprep.subr.mxu1 %v2980_v0 }
0x238c   :  { %2615 = vmatpush3.msra.mxu1 %v3298_v62 }
0x238d   :  { %2630 = vmatprep.subr.mxu1 %v2980_v0 }
0x2445   :  { %v1798_v55 = vpop.f32.mrf.mxu1 }
0x2446   :  { %v1809_v56 = vadd.f32 %v1798_v55, %v3333_v12  ;;  %v1802_v63 = vadd.f32 %v1798_v55, %v1729_v58 }
0x2447   :  { %v2596_v57 = vpop.f32.mrf.mxu1 }
0x2448   :  { %1811 = vrot.lane.b32.xlu0 %v1809_v56, %s2974_s7  ;;  %v2304_v1 = vmul.f32 -1.442695, %v1802_v63  ;;  %v2053_v56 = vld [vmem:[#allocation2 + $0x1c] sm:$0xf] }
0x244a   :  { %2731 = vpow2.f32 %v2304_v1 }
0x2457   :  { %v2732_v3 = vpop.eup %2731 }
0x2458   :  { %v1806_v5 = vadd.f32 1.0, %v2732_v3 }
0x245a   :  { %2733 = vrcp.f32 %v1806_v5 }
0x2467   :  { %v2734_v7 = vpop.eup %2733 }
0x24ba   :  { %v1812_v40 = vpop.permute.xlu0 %1811 }
0x24bb   :  { %v1814_v9 = vmul.f32 %v2734_v7, %v1812_v40 }
0x24bd   :  { %1816 = vrot.lane.b32.xlu1 %v1814_v9, %s2974_s7 }
0x252f   :  { %v1817_v10 = vpop.permute.xlu1 %1816 }
0x2530   :  { %v1819_v11 = vadd.f32 %v1817_v10, %v1729_v58 }
0x2532   :  { %2735 = vtanh.f32 %v1819_v11 }
0x253f   :  { %v2736_v13 = vpop.eup %2735 }
0x2540   :  { %v1821_v2 = vsub.f32 %v1723_v53, %v2736_v13 }
0x2542   :  { %1823 = vrot.lane.b32.xlu0 %v1821_v2, %s2983_s1  ;;  %v2165_v2 = vld [vmem:[%s3492_s10 + $0x18] sm:$0xff] }
0x25b4   :  { %v1824_v14 = vpop.permute.xlu0 %1823 }
0x25b5   :  { %v1826_v15 = vmul.f32 %v2734_v7, %v1824_v14  ;;  %v2164_v14 = vld [vmem:[%s3492_s10 + $0x10] sm:$0xff] }
0x25b7   :  { %1828 = vrot.lane.b32.xlu1 %v1826_v15, %s2982_s21  ;;  %v2163_v15 = vld [vmem:[%s3492_s10 + $0x8] sm:$0xff] }
0x2629   :  { %v1829_v16 = vpop.permute.xlu1 %1828 }
0x262a   :  { %v1831_v18 = vadd.f32 %v2736_v13, %v1829_v16  ;;  %v2162_v16 = vld [vmem:[%s3492_s10] sm:$0xff]  ;;  %s2935_s10 = scalar_lea.vmem %s2255_s25, 64 }
0x262b   :  { %p2936_p3 = scmp.ne.s32.totalorder %s2255_s25, %s2935_s10  ;;  %p2941_p5 = scmp.lt.s32.totalorder %s2935_s10, %s2935_s10 }
0x262c   :  { %1833 = vrot.lane.b32.xlu0 %v1831_v18, %s2974_s7 }
0x262d   :  { %p2942_p6 = por %p2941_p5, %p2940_p4 }
0x262f   :  { %p2943_p7 = pnand %p2942_p6, %p2936_p3 }
0x269e   :  { %v1834_v4 = vpop.permute.xlu0 %1833 }
0x269f   :  { %1836 = vst.msk [vmem:[#allocation3 + $0x10] sm:$0xf] %vm403_vm4, %v1834_v4  ;;  %2606 = vmatmul.mubr.msk.f32.vlgmr.msra.gmra.mxu0 %vm288_vm1, %v1834_v4 }
0x26a0   :  { %2620 = vmatpush3.msra.mxu0 %v3287_v59  ;;  %2627 = vmatprep.mubr.msk.f32.mxu0 %vm2981_vm0, %v2980_v0  ;;  %v1837_v59 = vld [vmem:[#allocation2 + $0x14] sm:$0xf] }
0x26a1   :  { %2621 = vmatprep.subr.mxu0 %v2980_v0 }
0x26a2   :  { %2622 = vmatpush3.msra.mxu0 %v3290_v60 }
0x26a3   :  { %2623 = vmatprep.subr.mxu0 %v2980_v0 }
0x26a4   :  { %2624 = vmatpush3.msra.mxu0 %v3294_v61 }
0x26a5   :  { %2625 = vmatprep.subr.mxu0 %v2980_v0 }
0x26a6   :  { %2626 = vmatpush3.msra.mxu0 %v3298_v62 }
0x275f   :  { %v1906_v19 = vpop.f32.mrf.mxu0 }
0x2760   :  { %v1917_v6 = vadd.f32 %v1906_v19, %v3333_v12  ;;  %v1910_v20 = vadd.f32 %v1906_v19, %v1837_v59 }
0x2761   :  { %v2607_v17 = vpop.f32.mrf.mxu0 }
0x2762   :  { %1919 = vrot.lane.b32.xlu1 %v1917_v6, %s2974_s7  ;;  %v2306_v21 = vmul.f32 -1.442695, %v1910_v20  ;;  %v2311_v17 = vld [vmem:[#allocation18] ss:$0 sm:$0xff] }
0x2764   :  { %2737 = vpow2.f32 %v2306_v21 }
0x2771   :  { %v2738_v8 = vpop.eup %2737 }
0x2772   :  { %v1914_v60 = vadd.f32 1.0, %v2738_v8 }
0x2774   :  { %2739 = vrcp.f32 %v1914_v60 }
0x2781   :  { %v2740_v22 = vpop.eup %2739 }
0x27d4   :  { %v1920_v23 = vpop.permute.xlu1 %1919 }
0x27d5   :  { %v1922_v61 = vmul.f32 %v2740_v22, %v1920_v23 }
0x27d7   :  { %1924 = vrot.lane.b32.xlu0 %v1922_v61, %s2974_s7 }
0x2849   :  { %v1925_v24 = vpop.permute.xlu0 %1924 }
0x284a   :  { %v1927_v62 = vadd.f32 %v1925_v24, %v1837_v59 }
0x284c   :  { %2741 = vtanh.f32 %v1927_v62 }
0x2859   :  { %v2742_v25 = vpop.eup %2741 }
0x285a   :  { %v1929_v26 = vsub.f32 %v1831_v18, %v2742_v25 }
0x285c   :  { %1931 = vrot.lane.b32.xlu1 %v1929_v26, %s2983_s1 }
0x28ce   :  { %v1932_v27 = vpop.permute.xlu1 %1931 }
0x28cf   :  { %v1934_v28 = vmul.f32 %v2740_v22, %v1932_v27 }
0x28d1   :  { %1936 = vrot.lane.b32.xlu0 %v1934_v28, %s2982_s21 }
0x2943   :  { %v1937_v29 = vpop.permute.xlu0 %1936 }
0x2944   :  { %v1939_v30 = vadd.f32 %v2742_v25, %v1937_v29 }
0x2946   :  { %1941 = vrot.lane.b32.xlu1 %v1939_v30, %s2974_s7 }
0x29b8   :  { %v1942_v31 = vpop.permute.xlu1 %1941 }
0x29b9   :  { %1944 = vst.msk [vmem:[#allocation3 + $0x14] sm:$0xf] %vm403_vm4, %v1942_v31  ;;  %2617 = vmatmul.mubr.msk.f32.vlgmr.msra.gmra.mxu1 %vm288_vm1, %v1942_v31 }
0x29ba   :  { %2638 = vmatprep.mubr.msk.f32.mxu1 %vm2981_vm0, %v2980_v0  ;;  %2631 = vmatpush3.msra.mxu1 %v2165_v2 }
0x29bb   :  { %2632 = vmatprep.subr.mxu1 %v2980_v0 }
0x29bc   :  { %2633 = vmatpush3.msra.mxu1 %v2164_v14 }
0x29bd   :  { %2634 = vmatprep.subr.mxu1 %v2980_v0 }
0x29be   :  { %2635 = vmatpush3.msra.mxu1 %v2163_v15 }
0x29bf   :  { %2636 = vmatprep.subr.mxu1 %v2980_v0 }
0x29c0   :  { %2637 = vmatpush3.msra.mxu1 %v2162_v16 }
0x2a79   :  { %v2014_v32 = vpop.f32.mrf.mxu1 }
0x2a7a   :  { %v2025_v33 = vadd.f32 %v2014_v32, %v3333_v12  ;;  %v2018_v36 = vadd.f32 %v2014_v32, %v1945_v35 }
0x2a7b   :  { %v2618_v34 = vpop.f32.mrf.mxu1 }
0x2a7c   :  { %2027 = vrot.lane.b32.xlu0 %v2025_v33, %s2974_s7  ;;  %v2308_v37 = vmul.f32 -1.442695, %v2018_v36 }
0x2a7e   :  { %2743 = vpow2.f32 %v2308_v37 }
0x2a8b   :  { %v2744_v38 = vpop.eup %2743 }
0x2a8c   :  { %v2022_v39 = vadd.f32 1.0, %v2744_v38 }
0x2a8e   :  { %2745 = vrcp.f32 %v2022_v39 }
0x2a9b   :  { %v2746_v41 = vpop.eup %2745 }
0x2aee   :  { %v2028_v42 = vpop.permute.xlu0 %2027 }
0x2aef   :  { %v2030_v43 = vmul.f32 %v2746_v41, %v2028_v42 }
0x2af1   :  { %2032 = vrot.lane.b32.xlu1 %v2030_v43, %s2974_s7 }
0x2b63   :  { %v2033_v44 = vpop.permute.xlu1 %2032 }
0x2b64   :  { %v2035_v45 = vadd.f32 %v2033_v44, %v1945_v35 }
0x2b66   :  { %2747 = vtanh.f32 %v2035_v45 }
0x2b73   :  { %v2748_v46 = vpop.eup %2747 }
0x2b74   :  { %v2037_v47 = vsub.f32 %v1939_v30, %v2748_v46 }
0x2b76   :  { %2039 = vrot.lane.b32.xlu0 %v2037_v47, %s2983_s1 }
0x2be8   :  { %v2040_v48 = vpop.permute.xlu0 %2039 }
0x2be9   :  { %v2042_v49 = vmul.f32 %v2746_v41, %v2040_v48 }
0x2beb   :  { %2044 = vrot.lane.b32.xlu1 %v2042_v49, %s2982_s21 }
0x2c5d   :  { %v2045_v50 = vpop.permute.xlu1 %2044 }
0x2c5e   :  { %v2047_v51 = vadd.f32 %v2748_v46, %v2045_v50 }
0x2c60   :  { %2049 = vrot.lane.b32.xlu0 %v2047_v51, %s2974_s7 }
0x2cd2   :  { %v2050_v52 = vpop.permute.xlu0 %2049 }
0x2cd3   :  { %2052 = vst.msk [vmem:[#allocation3 + $0x18] sm:$0xf] %vm403_vm4, %v2050_v52  ;;  %2628 = vmatmul.mubr.msk.f32.vlgmr.msra.gmra.mxu0 %vm288_vm1, %v2050_v52 }
0x2d93   :  { %v2122_v53 = vpop.f32.mrf.mxu0 }
0x2d94   :  { %v2133_v54 = vadd.f32 %v2122_v53, %v3333_v12  ;;  %v2126_v57 = vadd.f32 %v2122_v53, %v2053_v56 }
0x2d95   :  { %v2629_v55 = vpop.f32.mrf.mxu0 }
0x2d96   :  { %2135 = vrot.lane.b32.xlu1 %v2133_v54, %s2974_s7  ;;  %v2310_v58 = vmul.f32 -1.442695, %v2126_v57 }
0x2d98   :  { %2749 = vpow2.f32 %v2310_v58 }
0x2da5   :  { %v2750_v63 = vpop.eup %2749 }
0x2da6   :  { %v2130_v1 = vadd.f32 1.0, %v2750_v63 }
0x2da8   :  { %2751 = vrcp.f32 %v2130_v1 }
0x2db5   :  { %v2752_v3 = vpop.eup %2751 }
0x2e08   :  { %v2136_v5 = vpop.permute.xlu1 %2135 }
0x2e09   :  { %v2138_v7 = vmul.f32 %v2752_v3, %v2136_v5 }
0x2e0b   :  { %2140 = vrot.lane.b32.xlu0 %v2138_v7, %s2974_s7 }
0x2e7d   :  { %v2141_v40 = vpop.permute.xlu0 %2140 }
0x2e7e   :  { %v2143_v9 = vadd.f32 %v2141_v40, %v2053_v56 }
0x2e80   :  { %2753 = vtanh.f32 %v2143_v9 }
0x2e8d   :  { %v2754_v10 = vpop.eup %2753 }
0x2e8e   :  { %v2145_v12 = vsub.f32 %v2047_v51, %v2754_v10 }
0x2e90   :  { %2147 = vrot.lane.b32.xlu1 %v2145_v12, %s2983_s1 }
0x2f02   :  { %v2148_v11 = vpop.permute.xlu1 %2147 }
0x2f03   :  { %v2150_v13 = vmul.f32 %v2752_v3, %v2148_v11 }
0x2f05   :  { %2152 = vrot.lane.b32.xlu0 %v2150_v13, %s2982_s21 }
0x2f77   :  { %v2153_v18 = vpop.permute.xlu0 %2152 }
0x2f78   :  { %v2155_v4 = vadd.f32 %v2754_v10, %v2153_v18 }
0x2f7a   :  { %2157 = vrot.lane.b32.xlu1 %v2155_v4, %s2974_s7 }
0x2fec   :  { %v2158_v19 = vpop.permute.xlu1 %2157 }
0x2fed   :  { %2160 = vst.msk [vmem:[#allocation3 + $0x1c] sm:$0xf] %vm403_vm4, %v2158_v19 }
0x2ff4   :  { %v2161_v6 = vld [vmem:[#allocation3 + $0x1c] sm:$0xf] }
0x2ff5   :  { %2639 = vmatmul.mubr.msk.f32.vlgmr.msra.gmra.mxu1 %vm288_vm1, %v2161_v6 }
0x30b5   :  { %v2242_v59 = vpop.f32.mrf.mxu1 }
0x30b6   :  { %v2243_v20 = vadd.f32 %v2311_v17, %v2242_v59 }
0x30b7   :  { %v2640_v21 = vpop.f32.mrf.mxu1 }
0x30b8   :  { %2247 = vst.msk [vmem:[#allocation19] sm:$0xf] %vm2246_vm5, %v2243_v20 }
0x30b9   :  { %2946 = shalt.err (!%p2943_p7)
}
0x30ba   :  { %2257 = dma.vmem_to_hbm [thread:$0]  %s2255_s25, 64, %s3494_s12, [#allocation6]  }
0x30bb   :  { %2965 = dma.done.wait [#allocation6], 64  }
0x30bc   :  { %2966 = vsyncadd [#allocation6], 4294967232 }
0x30bd   :  { %2261 = vsyncpa [#allocation5], 1 }
0x30be   :  { %2262 = vsyncpa [#allocation8], 1 }
0x30bf   :  { %2263 = vsyncpa [#allocation11], 1 }
0x30c0   :  { %2264 = vsyncpa [#allocation14], 1 }
0x30c1   :  { %2265 = vsyncpa [#allocation17], 1 }
0x30c2   :  { %2266 = vsyncpa [#allocation6], 1 }

</bundles_post_ra>
